<compile_context>
chip_gen: v5e
topology: v5e:2x2
jax: 0.10.0
libtpu: 0.0.40
codegen_flags: <defaults>
</compile_context>

<pallas_src>
import math
import functools

import jax
import jax.numpy as jnp
from jax.experimental import pallas as pl
from jax.experimental.pallas import tpu as pltpu

EPS = 1e-10          # AGCNBlock.eps / Classifier.eps
TAU = 1.0            # AGCNBlock.tau (nn.Parameter initialized to 1.0)
FILT_PERCENT = 0.7   # Classifier default


# ----------------------------------------------------------------------------
# Fused AGCN-block kernel:
#   [build_adj only]  xn = F.normalize(x); a = 0.5*tanh(xn xn^T)+0.5
#                     adj = D^-1/2 a D^-1/2
#   hidden = relu(adj @ hidden @ W_l + b_l)   for every GCN layer
#   hidden = mask * hidden
#   att = 'neibor' attention (khop=1, dnorm=1, adj_norm='none', tau=1)
#   Z   = att * hidden
# Outputs: (adj if built,) att [B,1,N] lane-dense, Z [B,N,H]
# ----------------------------------------------------------------------------
def fused_block(X, mask, params, adj=None):
    B, N, Din = X.shape
    gcns = params["gcns"]                 # list of (w [Din,H], b [1,H])
    Hd = gcns[0][0].shape[1]
    n_gcn = len(gcns)
    build = adj is None
    eye = jnp.eye(N, dtype=jnp.float32)   # precomputed identity (diag extraction)
    mask3 = mask.reshape(B, N, 1)

    def kernel(*refs):
        if build:
            x_ref, m_ref, eye_ref = refs[:3]
            base = 3
        else:
            x_ref, a_ref, m_ref, eye_ref = refs[:4]
            base = 4
        w_refs = refs[base:base + 2 * n_gcn]
        wb_ref = refs[base + 2 * n_gcn]
        outs = refs[base + 2 * n_gcn + 1:]

        m = m_ref[0]                                  # [N, 1]
        eyem = eye_ref[...]                           # [N, N]

        if build:
            x = x_ref[0]                              # [N, C]
            nrm = jnp.sqrt(jnp.sum(x * x, axis=-1, keepdims=True))
            xn = x / jnp.maximum(nrm, 1e-12)          # F.normalize eps
            a = jax.lax.dot_general(xn, xn, (((1,), (1,)), ((), ())),
                                    preferred_element_type=jnp.float32)
            a = 0.5 * jnp.tanh(a) + 0.5               # symmetric by construction
            # reference sums dim=1; a is symmetric so row/col sums coincide,
            # letting us take the [N,1] and [1,N] reductions directly
            # (no lane<->sublane transpose).
            deg_c = jnp.sum(a, axis=1, keepdims=True)             # [N, 1]
            deg_c = jnp.where(deg_c == 0.0, 1e-10, deg_c)
            deg_r = jnp.sum(a, axis=0, keepdims=True)             # [1, N]
            deg_r = jnp.where(deg_r == 0.0, 1e-10, deg_r)
            adj_mat = jax.lax.rsqrt(deg_c) * a * jax.lax.rsqrt(deg_r)
            feat = xn
            adj_out, att_ref, z_ref = outs
            adj_out[0] = adj_mat
        else:
            feat = x_ref[0]
            adj_mat = a_ref[0]
            att_ref, z_ref = outs

        # --- GCN layers (unrolled; weights shared across batch) -------------
        h = feat
        for li in range(n_gcn):
            w = w_refs[2 * li][...]
            b = w_refs[2 * li + 1][...]
            y = jnp.dot(adj_mat, h, preferred_element_type=jnp.float32)
            y = jnp.dot(y, w, preferred_element_type=jnp.float32) + b
            h = jnp.maximum(y, 0.0)

        # --- 'neibor' attention ---------------------------------------------
        h = m * h                                               # mask * hidden
        att = jnp.dot(h, wb_ref[...], preferred_element_type=jnp.float32)
        att = att + (m - 1.0) * 1e10
        att_max = jnp.max(att, axis=0, keepdims=True)
        e = jnp.exp((att - att_max) * abs(TAU))                 # [N, 1]
        # single-column RHS matmul: pure MXU slack at this size (khop=1)
        denom = jnp.dot(adj_mat, e, preferred_element_type=jnp.float32) + EPS
        diag_a = jnp.sum(adj_mat * eyem, axis=1, keepdims=True)       # diag(adj)
        diag_scale = jnp.sum(adj_mat, axis=1, keepdims=True)    # == ref dim=1 (sym.)
        att_b = e * diag_a / denom
        att_b = att_b * diag_scale
        att_b = att_b * m                                       # [N, 1]

        z_ref[0] = att_b * h                                    # Z = att * hidden
        # lane-dense attention output [1, N] without an explicit transpose:
        att_ref[0] = jnp.sum(eyem * att_b, axis=0, keepdims=True)

    # ------------------------- specs / call ----------------------------------
    in_specs = [pl.BlockSpec((1, N, Din), lambda b: (b, 0, 0))]
    args = [X]
    if not build:
        in_specs.append(pl.BlockSpec((1, N, N), lambda b: (b, 0, 0)))
        args.append(adj)
    in_specs.append(pl.BlockSpec((1, N, 1), lambda b: (b, 0, 0)))
    args.append(mask3)
    in_specs.append(pl.BlockSpec((N, N), lambda b: (0, 0)))
    args.append(eye)
    for (w, bb) in gcns:
        in_specs.append(pl.BlockSpec(w.shape, lambda b: (0, 0)))
        args.append(w)
        in_specs.append(pl.BlockSpec(bb.shape, lambda b: (0, 0)))
        args.append(bb)
    in_specs.append(pl.BlockSpec(params["w_b"].shape, lambda b: (0, 0)))
    args.append(params["w_b"])

    out_shapes = []
    out_specs = []
    if build:
        out_shapes.append(jax.ShapeDtypeStruct((B, N, N), jnp.float32))
        out_specs.append(pl.BlockSpec((1, N, N), lambda b: (b, 0, 0)))
    out_shapes.append(jax.ShapeDtypeStruct((B, 1, N), jnp.float32))   # att (lane-dense)
    out_specs.append(pl.BlockSpec((1, 1, N), lambda b: (b, 0, 0)))
    out_shapes.append(jax.ShapeDtypeStruct((B, N, Hd), jnp.float32))  # Z
    out_specs.append(pl.BlockSpec((1, N, Hd), lambda b: (b, 0, 0)))

    outs = pl.pallas_call(
        kernel,
        out_shape=tuple(out_shapes),
        grid=(B,),
        in_specs=in_specs,
        out_specs=tuple(out_specs),
        compiler_params=pltpu.CompilerParams(dimension_semantics=("parallel",)),
    )(*args)

    if build:
        adj_out, att, Z = outs
    else:
        att, Z = outs
        adj_out = adj
    return adj_out, att.reshape(B, N), Z


# ----------------------------------------------------------------------------
# Fused pooling kernel (row gather done in-kernel, no XLA gather):
#   sel[k, :] = one_hot(top_index[k]) * valid[k]     (iota compare, VPU)
#   assign    = sel @ adj                            (row gather via MXU)
#   S         = assign / (assign.sum(dim over K) + eps)
#   H = S Z ;  new_adj = S A S^T
# ----------------------------------------------------------------------------
def _pool_kernel(idx_ref, valid_ref, z_ref, adj_ref, h_ref, nadj_ref):
    idx = idx_ref[0]                                            # [K, 1] int32
    valid = valid_ref[0]                                        # [K, 1] f32
    z = z_ref[0]                                                # [N, H]
    a = adj_ref[0]                                              # [N, N]
    K = idx.shape[0]
    N = a.shape[0]

    cols = jax.lax.broadcasted_iota(jnp.int32, (K, N), 1)
    sel = jnp.where(cols == idx, valid, 0.0)                    # [K, N] one-hot rows
    assign = jnp.dot(sel, a, preferred_element_type=jnp.float32)       # gathered rows
    col = jnp.sum(assign, axis=0, keepdims=True)                # sum over K -> [1, N]
    sn = assign / (col + EPS)
    h_ref[0] = jnp.dot(sn, z, preferred_element_type=jnp.float32)
    tmp = jnp.dot(sn, a, preferred_element_type=jnp.float32)    # [K, N]
    nadj_ref[0] = jax.lax.dot_general(tmp, sn, (((1,), (1,)), ((), ())),
                                      preferred_element_type=jnp.float32)


def pool_call(top_index, row_valid, Z, adj):
    B, K = top_index.shape
    N = adj.shape[-1]
    Hd = Z.shape[-1]
    idx3 = top_index.astype(jnp.int32).reshape(B, K, 1)
    val3 = row_valid.reshape(B, K, 1)
    return pl.pallas_call(
        _pool_kernel,
        out_shape=(jax.ShapeDtypeStruct((B, K, Hd), jnp.float32),
                   jax.ShapeDtypeStruct((B, K, K), jnp.float32)),
        grid=(B,),
        in_specs=[pl.BlockSpec((1, K, 1), lambda b: (b, 0, 0)),
                  pl.BlockSpec((1, K, 1), lambda b: (b, 0, 0)),
                  pl.BlockSpec((1, N, Hd), lambda b: (b, 0, 0)),
                  pl.BlockSpec((1, N, N), lambda b: (b, 0, 0))],
        out_specs=(pl.BlockSpec((1, K, Hd), lambda b: (b, 0, 0)),
                   pl.BlockSpec((1, K, K), lambda b: (b, 0, 0))),
        compiler_params=pltpu.CompilerParams(dimension_semantics=("parallel",)),
    )(idx3, val3, Z, adj)


# ----------------------------------------------------------------------------
# Sampling glue + pool.  The reference uses np.random.choice with the default
# replace=True; jax.random.categorical has the same with-replacement
# distribution (RNG bits differ).
# ----------------------------------------------------------------------------
def sample_and_pool(att, adj, Z, mask, key):
    B, N = mask.shape
    k_max = int(math.ceil(FILT_PERCENT * N))
    k_list = jnp.ceil(FILT_PERCENT * jnp.sum(mask, axis=1)).astype(jnp.int32)  # [B]

    # TODO(synk): np.random.choice RNG stream not reproduced bit-exactly;
    # categorical sampling (with replacement) matches its distribution.
    p = att * mask
    p = p / (jnp.sum(p, axis=1, keepdims=True) + EPS)     # EPS guards all-masked rows
    logits = jnp.log(p + 1e-30)
    keys = jax.random.split(key, B)
    top_index = jax.vmap(
        lambda k_, lg: jax.random.categorical(k_, lg, shape=(k_max,)))(keys, logits)

    new_mask = (jax.lax.broadcasted_iota(jnp.int32, (B, k_max), 1)
                < k_list[:, None]).astype(jnp.float32)

    H, new_adj = pool_call(top_index, new_mask, Z, adj)
    return H, new_adj, new_mask


# ----------------------------------------------------------------------------
# Classifier (model='agcn') forward: returns Xs[-1]
# (the per-block mean-pool embeds are dead in the reference's return value
#  and are therefore not computed.)
# ----------------------------------------------------------------------------
def classifier_forward(params, node_feat, mask_node, key):
    keys = jax.random.split(key, len(params["agcns"]))
    X, A, M = node_feat, None, mask_node
    for i, blk in enumerate(params["agcns"]):
        A_used, att, Z = fused_block(X, M, blk, adj=A)
        X, A, M = sample_and_pool(att, A_used, Z, M, keys[i])
    return X


# ----------------------------------------------------------------------------
# Deterministic parameter init (mirrors __init__ shapes)
# ----------------------------------------------------------------------------
def _xavier_normal(key, shape):
    fan_in, fan_out = shape
    std = math.sqrt(2.0 / (fan_in + fan_out))
    return std * jax.random.normal(key, shape, jnp.float32)


def init_params(key, input_dim, hidden_dim, num_layers=2):
    gcn_layer_list = [3] + [1] * (num_layers - 1)
    agcns = []
    x_size = input_dim
    for i in range(num_layers):
        gcns = []
        d_in = x_size
        for _ in range(gcn_layer_list[i]):
            key, k1 = jax.random.split(key)
            w = _xavier_normal(k1, (d_in, hidden_dim))
            b = jnp.zeros((1, hidden_dim), jnp.float32)
            gcns.append((w, b))
            d_in = hidden_dim
        key, k2 = jax.random.split(key)
        w_b = jax.random.uniform(k2, (hidden_dim, 1), jnp.float32, -1.0, 1.0)
        agcns.append({"gcns": gcns, "w_b": w_b})
        x_size = hidden_dim
    return {"agcns": agcns}


if __name__ == "__main__":
    B, N, IN_DIM, HID = 2, 16, 32, 32
    root = jax.random.PRNGKey(0)
    k_feat, k_param, k_samp = jax.random.split(root, 3)

    node_feat = jax.random.normal(k_feat, (B, N, IN_DIM), jnp.float32)
    mask_node = jnp.ones((B, N), jnp.float32)
    params = init_params(k_param, IN_DIM, HID)

    fwd = jax.jit(functools.partial(classifier_forward, params))
    out = fwd(node_feat, mask_node, k_samp)
    out = jax.block_until_ready(out)

    k1 = int(math.ceil(FILT_PERCENT * N))
    k2 = int(math.ceil(FILT_PERCENT * k1))
    assert out.shape == (B, k2, HID), out.shape
    assert bool(jnp.all(jnp.isfinite(out)))
    print("KERNEL_OK")
</pallas_src>

<mosaic_0001>
module attributes {stable_mosaic.version = 11 : i64} {
  func.func @_pool_kernel(%arg0: i32, %arg1: memref<1x12x1xi32, #tpu.memory_space<vmem>>, %arg2: memref<1x12x1xf32, #tpu.memory_space<vmem>>, %arg3: memref<1x16x32xf32, #tpu.memory_space<vmem>>, %arg4: memref<1x16x16xf32, #tpu.memory_space<vmem>>, %arg5: memref<1x12x32xf32, #tpu.memory_space<vmem>>, %arg6: memref<1x12x12xf32, #tpu.memory_space<vmem>>) attributes {dimension_semantics = [#tpu.dimension_semantics<parallel>], iteration_bounds = array<i64: 2>, scalar_prefetch = 0 : i64, scratch_operands = 0 : i64, tpu.core_type = #tpu.core_type<tc>, window_params = [{transform_indices = @transform_0, window_bounds = array<i64: 1, 12, 1>}, {transform_indices = @transform_1, window_bounds = array<i64: 1, 12, 1>}, {transform_indices = @transform_2, window_bounds = array<i64: 1, 16, 32>}, {transform_indices = @transform_3, window_bounds = array<i64: 1, 16, 16>}, {transform_indices = @transform_4, window_bounds = array<i64: 1, 12, 32>}, {transform_indices = @transform_5, window_bounds = array<i64: 1, 12, 12>}]} {
    %c0 = arith.constant 0 : index
    %c0_0 = arith.constant 0 : index
    %c0_1 = arith.constant 0 : index
    %0 = vector.load %arg1[%c0, %c0_0, %c0_1] : memref<1x12x1xi32, #tpu.memory_space<vmem>>, vector<1x12x1xi32>
    %1 = vector.shape_cast %0 : vector<1x12x1xi32> to vector<12x1xi32>
    %c0_2 = arith.constant 0 : index
    %c0_3 = arith.constant 0 : index
    %c0_4 = arith.constant 0 : index
    %2 = vector.load %arg2[%c0_2, %c0_3, %c0_4] : memref<1x12x1xf32, #tpu.memory_space<vmem>>, vector<1x12x1xf32>
    %3 = vector.shape_cast %2 : vector<1x12x1xf32> to vector<12x1xf32>
    %c0_5 = arith.constant 0 : index
    %c0_6 = arith.constant 0 : index
    %c0_7 = arith.constant 0 : index
    %4 = vector.load %arg3[%c0_5, %c0_6, %c0_7] : memref<1x16x32xf32, #tpu.memory_space<vmem>>, vector<1x16x32xf32>
    %5 = vector.shape_cast %4 : vector<1x16x32xf32> to vector<16x32xf32>
    %c0_8 = arith.constant 0 : index
    %c0_9 = arith.constant 0 : index
    %c0_10 = arith.constant 0 : index
    %6 = vector.load %arg4[%c0_8, %c0_9, %c0_10] : memref<1x16x16xf32, #tpu.memory_space<vmem>>, vector<1x16x16xf32>
    %7 = vector.shape_cast %6 : vector<1x16x16xf32> to vector<16x16xf32>
    %8 = tpu.iota {dimensions = array<i32: 1>} : vector<12x16xi32>
    %9 = vector.broadcast %1 : vector<12x1xi32> to vector<12x16xi32>
    %10 = arith.cmpi eq, %8, %9 : vector<12x16xi32>
    %cst = arith.constant 0.000000e+00 : f32
    %11 = vector.shape_cast %3 : vector<12x1xf32> to vector<12x1xf32>
    %12 = vector.broadcast %11 : vector<12x1xf32> to vector<12x16xf32>
    %13 = vector.broadcast %cst : f32 to vector<12x16xf32>
    %14 = arith.select %10, %12, %13 : vector<12x16xi1>, vector<12x16xf32>
    %cst_11 = arith.constant dense<0.000000e+00> : vector<12x16xf32>
    %15 = tpu.matmul %14, %7, %cst_11 {dimension_numbers = #tpu.dot_dimension_numbers<[1], [0], [0], [1], [0, 0, 1, 1], [], []>} : vector<12x16xf32>, vector<16x16xf32>, vector<12x16xf32> -> vector<12x16xf32>
    %cst_12 = arith.constant dense<0.000000e+00> : vector<16xf32>
    %16 = vector.multi_reduction <add>, %15, %cst_12 [0] : vector<12x16xf32> to vector<16xf32>
    %17 = vector.shape_cast %16 : vector<16xf32> to vector<1x16xf32>
    %cst_13 = arith.constant 1.000000e-10 : f32
    %18 = vector.broadcast %cst_13 : f32 to vector<1x16xf32>
    %19 = arith.addf %17, %18 : vector<1x16xf32>
    %20 = vector.broadcast %19 : vector<1x16xf32> to vector<12x16xf32>
    %21 = arith.divf %15, %20 : vector<12x16xf32>
    %cst_14 = arith.constant dense<0.000000e+00> : vector<12x32xf32>
    %22 = tpu.matmul %21, %5, %cst_14 {dimension_numbers = #tpu.dot_dimension_numbers<[1], [0], [0], [1], [0, 0, 1, 1], [], []>} : vector<12x16xf32>, vector<16x32xf32>, vector<12x32xf32> -> vector<12x32xf32>
    %c0_15 = arith.constant 0 : index
    %c0_16 = arith.constant 0 : index
    %c0_17 = arith.constant 0 : index
    %23 = vector.load %arg5[%c0_15, %c0_16, %c0_17] : memref<1x12x32xf32, #tpu.memory_space<vmem>>, vector<1x12x32xf32>
    %24 = vector.shape_cast %23 : vector<1x12x32xf32> to vector<12x32xf32>
    %25 = vector.shape_cast %22 : vector<12x32xf32> to vector<1x12x32xf32>
    tpu.vector_store %arg5[%c0_15, %c0_16, %c0_17], %25 {strides = array<i32>} : memref<1x12x32xf32, #tpu.memory_space<vmem>>, vector<1x12x32xf32>,
    %cst_18 = arith.constant dense<0.000000e+00> : vector<12x16xf32>
    %26 = tpu.matmul %21, %7, %cst_18 {dimension_numbers = #tpu.dot_dimension_numbers<[1], [0], [0], [1], [0, 0, 1, 1], [], []>} : vector<12x16xf32>, vector<16x16xf32>, vector<12x16xf32> -> vector<12x16xf32>
    %cst_19 = arith.constant dense<0.000000e+00> : vector<12x12xf32>
    %27 = tpu.matmul %26, %21, %cst_19 {dimension_numbers = #tpu.dot_dimension_numbers<[1], [1], [0], [0], [0, 0, 1, 0], [], []>} : vector<12x16xf32>, vector<12x16xf32>, vector<12x12xf32> -> vector<12x12xf32>
    %c0_20 = arith.constant 0 : index
    %c0_21 = arith.constant 0 : index
    %c0_22 = arith.constant 0 : index
    %28 = vector.load %arg6[%c0_20, %c0_21, %c0_22] : memref<1x12x12xf32, #tpu.memory_space<vmem>>, vector<1x12x12xf32>
    %29 = vector.shape_cast %28 : vector<1x12x12xf32> to vector<12x12xf32>
    %30 = vector.shape_cast %27 : vector<12x12xf32> to vector<1x12x12xf32>
    tpu.vector_store %arg6[%c0_20, %c0_21, %c0_22], %30 {strides = array<i32>} : memref<1x12x12xf32, #tpu.memory_space<vmem>>, vector<1x12x12xf32>,
    return
  }
  func.func @transform_0(%arg0: i32) -> (i32, i32, i32) {
    %c0_i32 = arith.constant 0 : i32
    %c0_i32_0 = arith.constant 0 : i32
    %c0_i32_1 = arith.constant 0 : i32
    return %arg0, %c0_i32, %c0_i32_0 : i32, i32, i32
  }
  func.func @transform_1(%arg0: i32) -> (i32, i32, i32) {
    %c0_i32 = arith.constant 0 : i32
    %c0_i32_0 = arith.constant 0 : i32
    %c0_i32_1 = arith.constant 0 : i32
    return %arg0, %c0_i32, %c0_i32_0 : i32, i32, i32
  }
  func.func @transform_2(%arg0: i32) -> (i32, i32, i32) {
    %c0_i32 = arith.constant 0 : i32
    %c0_i32_0 = arith.constant 0 : i32
    %c0_i32_1 = arith.constant 0 : i32
    return %arg0, %c0_i32, %c0_i32_0 : i32, i32, i32
  }
  func.func @transform_3(%arg0: i32) -> (i32, i32, i32) {
    %c0_i32 = arith.constant 0 : i32
    %c0_i32_0 = arith.constant 0 : i32
    %c0_i32_1 = arith.constant 0 : i32
    return %arg0, %c0_i32, %c0_i32_0 : i32, i32, i32
  }
  func.func @transform_4(%arg0: i32) -> (i32, i32, i32) {
    %c0_i32 = arith.constant 0 : i32
    %c0_i32_0 = arith.constant 0 : i32
    %c0_i32_1 = arith.constant 0 : i32
    return %arg0, %c0_i32, %c0_i32_0 : i32, i32, i32
  }
  func.func @transform_5(%arg0: i32) -> (i32, i32, i32) {
    %c0_i32 = arith.constant 0 : i32
    %c0_i32_0 = arith.constant 0 : i32
    %c0_i32_1 = arith.constant 0 : i32
    return %arg0, %c0_i32, %c0_i32_0 : i32, i32, i32
  }
}

module attributes {stable_mosaic.version = 11 : i64} {
  func.func @kernel(%arg0: i32, %arg1: memref<1x16x32xf32, #tpu.memory_space<vmem>>, %arg2: memref<1x16x1xf32, #tpu.memory_space<vmem>>, %arg3: memref<16x16xf32, #tpu.memory_space<vmem>>, %arg4: memref<32x32xf32, #tpu.memory_space<vmem>>, %arg5: memref<1x32xf32, #tpu.memory_space<vmem>>, %arg6: memref<32x32xf32, #tpu.memory_space<vmem>>, %arg7: memref<1x32xf32, #tpu.memory_space<vmem>>, %arg8: memref<32x32xf32, #tpu.memory_space<vmem>>, %arg9: memref<1x32xf32, #tpu.memory_space<vmem>>, %arg10: memref<32x1xf32, #tpu.memory_space<vmem>>, %arg11: memref<1x16x16xf32, #tpu.memory_space<vmem>>, %arg12: memref<1x1x16xf32, #tpu.memory_space<vmem>>, %arg13: memref<1x16x32xf32, #tpu.memory_space<vmem>>) attributes {dimension_semantics = [#tpu.dimension_semantics<parallel>], iteration_bounds = array<i64: 2>, scalar_prefetch = 0 : i64, scratch_operands = 0 : i64, tpu.core_type = #tpu.core_type<tc>, window_params = [{transform_indices = @transform_0, window_bounds = array<i64: 1, 16, 32>}, {transform_indices = @transform_1, window_bounds = array<i64: 1, 16, 1>}, {pipeline_mode = #tpu.pipeline_mode<synchronous>, transform_indices = @transform_2, window_bounds = array<i64: 16, 16>}, {pipeline_mode = #tpu.pipeline_mode<synchronous>, transform_indices = @transform_3, window_bounds = array<i64: 32, 32>}, {pipeline_mode = #tpu.pipeline_mode<synchronous>, transform_indices = @transform_4, window_bounds = array<i64: 1, 32>}, {pipeline_mode = #tpu.pipeline_mode<synchronous>, transform_indices = @transform_5, window_bounds = array<i64: 32, 32>}, {pipeline_mode = #tpu.pipeline_mode<synchronous>, transform_indices = @transform_6, window_bounds = array<i64: 1, 32>}, {pipeline_mode = #tpu.pipeline_mode<synchronous>, transform_indices = @transform_7, window_bounds = array<i64: 32, 32>}, {pipeline_mode = #tpu.pipeline_mode<synchronous>, transform_indices = @transform_8, window_bounds = array<i64: 1, 32>}, {pipeline_mode = #tpu.pipeline_mode<synchronous>, transform_indices = @transform_9, window_bounds = array<i64: 32, 1>}, {transform_indices = @transform_10, window_bounds = array<i64: 1, 16, 16>}, {transform_indices = @transform_11, window_bounds = array<i64: 1, 1, 16>}, {transform_indices = @transform_12, window_bounds = array<i64: 1, 16, 32>}]} {
    %c0 = arith.constant 0 : index
    %c0_0 = arith.constant 0 : index
    %c0_1 = arith.constant 0 : index
    %0 = vector.load %arg2[%c0, %c0_0, %c0_1] : memref<1x16x1xf32, #tpu.memory_space<vmem>>, vector<1x16x1xf32>
    %1 = vector.shape_cast %0 : vector<1x16x1xf32> to vector<16x1xf32>
    %c0_2 = arith.constant 0 : index
    %c0_3 = arith.constant 0 : index
    %2 = vector.load %arg3[%c0_2, %c0_3] : memref<16x16xf32, #tpu.memory_space<vmem>>, vector<16x16xf32>
    %c0_4 = arith.constant 0 : index
    %c0_5 = arith.constant 0 : index
    %c0_6 = arith.constant 0 : index
    %3 = vector.load %arg1[%c0_4, %c0_5, %c0_6] : memref<1x16x32xf32, #tpu.memory_space<vmem>>, vector<1x16x32xf32>
    %4 = vector.shape_cast %3 : vector<1x16x32xf32> to vector<16x32xf32>
    %5 = arith.mulf %4, %4 : vector<16x32xf32>
    %cst = arith.constant dense<0.000000e+00> : vector<16xf32>
    %6 = vector.multi_reduction <add>, %5, %cst [1] : vector<16x32xf32> to vector<16xf32>
    %7 = vector.shape_cast %6 : vector<16xf32> to vector<16x1xf32>
    %8 = math.sqrt %7 : vector<16x1xf32>
    %cst_7 = arith.constant 9.99999996E-13 : f32
    %9 = vector.broadcast %cst_7 : f32 to vector<16x1xf32>
    %10 = arith.maximumf %8, %9 : vector<16x1xf32>
    %11 = vector.broadcast %10 : vector<16x1xf32> to vector<16x32xf32>
    %12 = arith.divf %4, %11 : vector<16x32xf32>
    %cst_8 = arith.constant dense<0.000000e+00> : vector<16x16xf32>
    %13 = tpu.matmul %12, %12, %cst_8 {dimension_numbers = #tpu.dot_dimension_numbers<[1], [1], [0], [0], [0, 0, 1, 0], [], []>} : vector<16x32xf32>, vector<16x32xf32>, vector<16x16xf32> -> vector<16x16xf32>
    %14 = math.tanh %13 : vector<16x16xf32>
    %cst_9 = arith.constant 5.000000e-01 : f32
    %15 = vector.broadcast %cst_9 : f32 to vector<16x16xf32>
    %16 = arith.mulf %15, %14 : vector<16x16xf32>
    %cst_10 = arith.constant 5.000000e-01 : f32
    %17 = vector.broadcast %cst_10 : f32 to vector<16x16xf32>
    %18 = arith.addf %16, %17 : vector<16x16xf32>
    %cst_11 = arith.constant dense<0.000000e+00> : vector<16xf32>
    %19 = vector.multi_reduction <add>, %18, %cst_11 [1] : vector<16x16xf32> to vector<16xf32>
    %20 = vector.shape_cast %19 : vector<16xf32> to vector<16x1xf32>
    %cst_12 = arith.constant 0.000000e+00 : f32
    %21 = vector.broadcast %cst_12 : f32 to vector<16x1xf32>
    %22 = arith.cmpf oeq, %20, %21 : vector<16x1xf32>
    %cst_13 = arith.constant 1.000000e-10 : f32
    %23 = vector.broadcast %cst_13 : f32 to vector<16x1xf32>
    %24 = arith.select %22, %23, %20 : vector<16x1xi1>, vector<16x1xf32>
    %cst_14 = arith.constant dense<0.000000e+00> : vector<16xf32>
    %25 = vector.multi_reduction <add>, %18, %cst_14 [0] : vector<16x16xf32> to vector<16xf32>
    %26 = vector.shape_cast %25 : vector<16xf32> to vector<1x16xf32>
    %cst_15 = arith.constant 0.000000e+00 : f32
    %27 = vector.broadcast %cst_15 : f32 to vector<1x16xf32>
    %28 = arith.cmpf oeq, %26, %27 : vector<1x16xf32>
    %cst_16 = arith.constant 1.000000e-10 : f32
    %29 = vector.broadcast %cst_16 : f32 to vector<1x16xf32>
    %30 = arith.select %28, %29, %26 : vector<1x16xi1>, vector<1x16xf32>
    %31 = math.rsqrt %24 : vector<16x1xf32>
    %32 = vector.broadcast %31 : vector<16x1xf32> to vector<16x16xf32>
    %33 = arith.mulf %32, %18 : vector<16x16xf32>
    %34 = math.rsqrt %30 : vector<1x16xf32>
    %35 = vector.broadcast %34 : vector<1x16xf32> to vector<16x16xf32>
    %36 = arith.mulf %33, %35 : vector<16x16xf32>
    %c0_17 = arith.constant 0 : index
    %c0_18 = arith.constant 0 : index
    %c0_19 = arith.constant 0 : index
    %37 = vector.load %arg11[%c0_17, %c0_18, %c0_19] : memref<1x16x16xf32, #tpu.memory_space<vmem>>, vector<1x16x16xf32>
    %38 = vector.shape_cast %37 : vector<1x16x16xf32> to vector<16x16xf32>
    %39 = vector.shape_cast %36 : vector<16x16xf32> to vector<1x16x16xf32>
    tpu.vector_store %arg11[%c0_17, %c0_18, %c0_19], %39 {strides = array<i32>} : memref<1x16x16xf32, #tpu.memory_space<vmem>>, vector<1x16x16xf32>,
    %c0_20 = arith.constant 0 : index
    %c0_21 = arith.constant 0 : index
    %40 = vector.load %arg4[%c0_20, %c0_21] : memref<32x32xf32, #tpu.memory_space<vmem>>, vector<32x32xf32>
    %c0_22 = arith.constant 0 : index
    %c0_23 = arith.constant 0 : index
    %41 = vector.load %arg5[%c0_22, %c0_23] : memref<1x32xf32, #tpu.memory_space<vmem>>, vector<1x32xf32>
    %cst_24 = arith.constant dense<0.000000e+00> : vector<16x32xf32>
    %42 = tpu.matmul %36, %12, %cst_24 {dimension_numbers = #tpu.dot_dimension_numbers<[1], [0], [0], [1], [0, 0, 1, 1], [], []>} : vector<16x16xf32>, vector<16x32xf32>, vector<16x32xf32> -> vector<16x32xf32>
    %cst_25 = arith.constant dense<0.000000e+00> : vector<16x32xf32>
    %43 = tpu.matmul %42, %40, %cst_25 {dimension_numbers = #tpu.dot_dimension_numbers<[1], [0], [0], [1], [0, 0, 1, 1], [], []>} : vector<16x32xf32>, vector<32x32xf32>, vector<16x32xf32> -> vector<16x32xf32>
    %44 = vector.broadcast %41 : vector<1x32xf32> to vector<16x32xf32>
    %45 = arith.addf %43, %44 : vector<16x32xf32>
    %cst_26 = arith.constant 0.000000e+00 : f32
    %46 = vector.broadcast %cst_26 : f32 to vector<16x32xf32>
    %47 = arith.maximumf %45, %46 : vector<16x32xf32>
    %c0_27 = arith.constant 0 : index
    %c0_28 = arith.constant 0 : index
    %48 = vector.load %arg6[%c0_27, %c0_28] : memref<32x32xf32, #tpu.memory_space<vmem>>, vector<32x32xf32>
    %c0_29 = arith.constant 0 : index
    %c0_30 = arith.constant 0 : index
    %49 = vector.load %arg7[%c0_29, %c0_30] : memref<1x32xf32, #tpu.memory_space<vmem>>, vector<1x32xf32>
    %cst_31 = arith.constant dense<0.000000e+00> : vector<16x32xf32>
    %50 = tpu.matmul %36, %47, %cst_31 {dimension_numbers = #tpu.dot_dimension_numbers<[1], [0], [0], [1], [0, 0, 1, 1], [], []>} : vector<16x16xf32>, vector<16x32xf32>, vector<16x32xf32> -> vector<16x32xf32>
    %cst_32 = arith.constant dense<0.000000e+00> : vector<16x32xf32>
    %51 = tpu.matmul %50, %48, %cst_32 {dimension_numbers = #tpu.dot_dimension_numbers<[1], [0], [0], [1], [0, 0, 1, 1], [], []>} : vector<16x32xf32>, vector<32x32xf32>, vector<16x32xf32> -> vector<16x32xf32>
    %52 = vector.broadcast %49 : vector<1x32xf32> to vector<16x32xf32>
    %53 = arith.addf %51, %52 : vector<16x32xf32>
    %cst_33 = arith.constant 0.000000e+00 : f32
    %54 = vector.broadcast %cst_33 : f32 to vector<16x32xf32>
    %55 = arith.maximumf %53, %54 : vector<16x32xf32>
    %c0_34 = arith.constant 0 : index
    %c0_35 = arith.constant 0 : index
    %56 = vector.load %arg8[%c0_34, %c0_35] : memref<32x32xf32, #tpu.memory_space<vmem>>, vector<32x32xf32>
    %c0_36 = arith.constant 0 : index
    %c0_37 = arith.constant 0 : index
    %57 = vector.load %arg9[%c0_36, %c0_37] : memref<1x32xf32, #tpu.memory_space<vmem>>, vector<1x32xf32>
    %cst_38 = arith.constant dense<0.000000e+00> : vector<16x32xf32>
    %58 = tpu.matmul %36, %55, %cst_38 {dimension_numbers = #tpu.dot_dimension_numbers<[1], [0], [0], [1], [0, 0, 1, 1], [], []>} : vector<16x16xf32>, vector<16x32xf32>, vector<16x32xf32> -> vector<16x32xf32>
    %cst_39 = arith.constant dense<0.000000e+00> : vector<16x32xf32>
    %59 = tpu.matmul %58, %56, %cst_39 {dimension_numbers = #tpu.dot_dimension_numbers<[1], [0], [0], [1], [0, 0, 1, 1], [], []>} : vector<16x32xf32>, vector<32x32xf32>, vector<16x32xf32> -> vector<16x32xf32>
    %60 = vector.broadcast %57 : vector<1x32xf32> to vector<16x32xf32>
    %61 = arith.addf %59, %60 : vector<16x32xf32>
    %cst_40 = arith.constant 0.000000e+00 : f32
    %62 = vector.broadcast %cst_40 : f32 to vector<16x32xf32>
    %63 = arith.maximumf %61, %62 : vector<16x32xf32>
    %64 = vector.broadcast %1 : vector<16x1xf32> to vector<16x32xf32>
    %65 = arith.mulf %64, %63 : vector<16x32xf32>
    %c0_41 = arith.constant 0 : index
    %c0_42 = arith.constant 0 : index
    %66 = vector.load %arg10[%c0_41, %c0_42] : memref<32x1xf32, #tpu.memory_space<vmem>>, vector<32x1xf32>
    %cst_43 = arith.constant dense<0.000000e+00> : vector<16x1xf32>
    %67 = tpu.matmul %65, %66, %cst_43 {dimension_numbers = #tpu.dot_dimension_numbers<[1], [0], [0], [1], [0, 0, 1, 1], [], []>} : vector<16x32xf32>, vector<32x1xf32>, vector<16x1xf32> -> vector<16x1xf32>
    %cst_44 = arith.constant 1.000000e+00 : f32
    %68 = vector.broadcast %cst_44 : f32 to vector<16x1xf32>
    %69 = arith.subf %1, %68 : vector<16x1xf32>
    %cst_45 = arith.constant 1.000000e+10 : f32
    %70 = vector.broadcast %cst_45 : f32 to vector<16x1xf32>
    %71 = arith.mulf %69, %70 : vector<16x1xf32>
    %72 = arith.addf %67, %71 : vector<16x1xf32>
    %cst_46 = arith.constant dense<0xFF800000> : vector<1xf32>
    %73 = vector.multi_reduction <maximumf>, %72, %cst_46 [0] : vector<16x1xf32> to vector<1xf32>
    %74 = vector.shape_cast %73 : vector<1xf32> to vector<1x1xf32>
    %75 = vector.broadcast %74 : vector<1x1xf32> to vector<16x1xf32>
    %76 = arith.subf %72, %75 : vector<16x1xf32>
    %cst_47 = arith.constant 1.000000e+00 : f32
    %77 = vector.broadcast %cst_47 : f32 to vector<16x1xf32>
    %78 = arith.mulf %76, %77 : vector<16x1xf32>
    %79 = math.exp %78 : vector<16x1xf32>
    %cst_48 = arith.constant dense<0.000000e+00> : vector<16x1xf32>
    %80 = tpu.matmul %36, %79, %cst_48 {dimension_numbers = #tpu.dot_dimension_numbers<[1], [0], [0], [1], [0, 0, 1, 1], [], []>} : vector<16x16xf32>, vector<16x1xf32>, vector<16x1xf32> -> vector<16x1xf32>
    %cst_49 = arith.constant 1.000000e-10 : f32
    %81 = vector.broadcast %cst_49 : f32 to vector<16x1xf32>
    %82 = arith.addf %80, %81 : vector<16x1xf32>
    %83 = arith.mulf %36, %2 : vector<16x16xf32>
    %cst_50 = arith.constant dense<0.000000e+00> : vector<16xf32>
    %84 = vector.multi_reduction <add>, %83, %cst_50 [1] : vector<16x16xf32> to vector<16xf32>
    %85 = vector.shape_cast %84 : vector<16xf32> to vector<16x1xf32>
    %cst_51 = arith.constant dense<0.000000e+00> : vector<16xf32>
    %86 = vector.multi_reduction <add>, %36, %cst_51 [1] : vector<16x16xf32> to vector<16xf32>
    %87 = vector.shape_cast %86 : vector<16xf32> to vector<16x1xf32>
    %88 = arith.mulf %79, %85 : vector<16x1xf32>
    %89 = arith.divf %88, %82 : vector<16x1xf32>
    %90 = arith.mulf %89, %87 : vector<16x1xf32>
    %91 = arith.mulf %90, %1 : vector<16x1xf32>
    %92 = vector.broadcast %91 : vector<16x1xf32> to vector<16x32xf32>
    %93 = arith.mulf %92, %65 : vector<16x32xf32>
    %c0_52 = arith.constant 0 : index
    %c0_53 = arith.constant 0 : index
    %c0_54 = arith.constant 0 : index
    %94 = vector.load %arg13[%c0_52, %c0_53, %c0_54] : memref<1x16x32xf32, #tpu.memory_space<vmem>>, vector<1x16x32xf32>
    %95 = vector.shape_cast %94 : vector<1x16x32xf32> to vector<16x32xf32>
    %96 = vector.shape_cast %93 : vector<16x32xf32> to vector<1x16x32xf32>
    tpu.vector_store %arg13[%c0_52, %c0_53, %c0_54], %96 {strides = array<i32>} : memref<1x16x32xf32, #tpu.memory_space<vmem>>, vector<1x16x32xf32>,
    %97 = vector.broadcast %91 : vector<16x1xf32> to vector<16x16xf32>
    %98 = arith.mulf %2, %97 : vector<16x16xf32>
    %cst_55 = arith.constant dense<0.000000e+00> : vector<16xf32>
    %99 = vector.multi_reduction <add>, %98, %cst_55 [0] : vector<16x16xf32> to vector<16xf32>
    %100 = vector.shape_cast %99 : vector<16xf32> to vector<1x16xf32>
    %c0_56 = arith.constant 0 : index
    %c0_57 = arith.constant 0 : index
    %c0_58 = arith.constant 0 : index
    %101 = vector.load %arg12[%c0_56, %c0_57, %c0_58] : memref<1x1x16xf32, #tpu.memory_space<vmem>>, vector<1x1x16xf32>
    %102 = vector.shape_cast %101 : vector<1x1x16xf32> to vector<1x16xf32>
    %103 = vector.shape_cast %100 : vector<1x16xf32> to vector<1x1x16xf32>
    tpu.vector_store %arg12[%c0_56, %c0_57, %c0_58], %103 {strides = array<i32>} : memref<1x1x16xf32, #tpu.memory_space<vmem>>, vector<1x1x16xf32>,
    return
  }
  func.func @transform_0(%arg0: i32) -> (i32, i32, i32) {
    %c0_i32 = arith.constant 0 : i32
    %c0_i32_0 = arith.constant 0 : i32
    %c0_i32_1 = arith.constant 0 : i32
    return %arg0, %c0_i32, %c0_i32_0 : i32, i32, i32
  }
  func.func @transform_1(%arg0: i32) -> (i32, i32, i32) {
    %c0_i32 = arith.constant 0 : i32
    %c0_i32_0 = arith.constant 0 : i32
    %c0_i32_1 = arith.constant 0 : i32
    return %arg0, %c0_i32, %c0_i32_0 : i32, i32, i32
  }
  func.func @transform_2(%arg0: i32) -> (i32, i32) {
    %c0_i32 = arith.constant 0 : i32
    %c0_i32_0 = arith.constant 0 : i32
    %c0_i32_1 = arith.constant 0 : i32
    return %c0_i32, %c0_i32_0 : i32, i32
  }
  func.func @transform_3(%arg0: i32) -> (i32, i32) {
    %c0_i32 = arith.constant 0 : i32
    %c0_i32_0 = arith.constant 0 : i32
    %c0_i32_1 = arith.constant 0 : i32
    return %c0_i32, %c0_i32_0 : i32, i32
  }
  func.func @transform_4(%arg0: i32) -> (i32, i32) {
    %c0_i32 = arith.constant 0 : i32
    %c0_i32_0 = arith.constant 0 : i32
    %c0_i32_1 = arith.constant 0 : i32
    return %c0_i32, %c0_i32_0 : i32, i32
  }
  func.func @transform_5(%arg0: i32) -> (i32, i32) {
    %c0_i32 = arith.constant 0 : i32
    %c0_i32_0 = arith.constant 0 : i32
    %c0_i32_1 = arith.constant 0 : i32
    return %c0_i32, %c0_i32_0 : i32, i32
  }
  func.func @transform_6(%arg0: i32) -> (i32, i32) {
    %c0_i32 = arith.constant 0 : i32
    %c0_i32_0 = arith.constant 0 : i32
    %c0_i32_1 = arith.constant 0 : i32
    return %c0_i32, %c0_i32_0 : i32, i32
  }
  func.func @transform_7(%arg0: i32) -> (i32, i32) {
    %c0_i32 = arith.constant 0 : i32
    %c0_i32_0 = arith.constant 0 : i32
    %c0_i32_1 = arith.constant 0 : i32
    return %c0_i32, %c0_i32_0 : i32, i32
  }
  func.func @transform_8(%arg0: i32) -> (i32, i32) {
    %c0_i32 = arith.constant 0 : i32
    %c0_i32_0 = arith.constant 0 : i32
    %c0_i32_1 = arith.constant 0 : i32
    return %c0_i32, %c0_i32_0 : i32, i32
  }
  func.func @transform_9(%arg0: i32) -> (i32, i32) {
    %c0_i32 = arith.constant 0 : i32
    %c0_i32_0 = arith.constant 0 : i32
    %c0_i32_1 = arith.constant 0 : i32
    return %c0_i32, %c0_i32_0 : i32, i32
  }
  func.func @transform_10(%arg0: i32) -> (i32, i32, i32) {
    %c0_i32 = arith.constant 0 : i32
    %c0_i32_0 = arith.constant 0 : i32
    %c0_i32_1 = arith.constant 0 : i32
    return %arg0, %c0_i32, %c0_i32_0 : i32, i32, i32
  }
  func.func @transform_11(%arg0: i32) -> (i32, i32, i32) {
    %c0_i32 = arith.constant 0 : i32
    %c0_i32_0 = arith.constant 0 : i32
    %c0_i32_1 = arith.constant 0 : i32
    return %arg0, %c0_i32, %c0_i32_0 : i32, i32, i32
  }
  func.func @transform_12(%arg0: i32) -> (i32, i32, i32) {
    %c0_i32 = arith.constant 0 : i32
    %c0_i32_0 = arith.constant 0 : i32
    %c0_i32_1 = arith.constant 0 : i32
    return %arg0, %c0_i32, %c0_i32_0 : i32, i32, i32
  }
}

module attributes {stable_mosaic.version = 11 : i64} {
  func.func @kernel(%arg0: i32, %arg1: memref<1x12x32xf32, #tpu.memory_space<vmem>>, %arg2: memref<1x12x12xf32, #tpu.memory_space<vmem>>, %arg3: memref<1x12x1xf32, #tpu.memory_space<vmem>>, %arg4: memref<12x12xf32, #tpu.memory_space<vmem>>, %arg5: memref<32x32xf32, #tpu.memory_space<vmem>>, %arg6: memref<1x32xf32, #tpu.memory_space<vmem>>, %arg7: memref<32x1xf32, #tpu.memory_space<vmem>>, %arg8: memref<1x1x12xf32, #tpu.memory_space<vmem>>, %arg9: memref<1x12x32xf32, #tpu.memory_space<vmem>>) attributes {dimension_semantics = [#tpu.dimension_semantics<parallel>], iteration_bounds = array<i64: 2>, scalar_prefetch = 0 : i64, scratch_operands = 0 : i64, tpu.core_type = #tpu.core_type<tc>, window_params = [{transform_indices = @transform_0, window_bounds = array<i64: 1, 12, 32>}, {transform_indices = @transform_1, window_bounds = array<i64: 1, 12, 12>}, {transform_indices = @transform_2, window_bounds = array<i64: 1, 12, 1>}, {pipeline_mode = #tpu.pipeline_mode<synchronous>, transform_indices = @transform_3, window_bounds = array<i64: 12, 12>}, {pipeline_mode = #tpu.pipeline_mode<synchronous>, transform_indices = @transform_4, window_bounds = array<i64: 32, 32>}, {pipeline_mode = #tpu.pipeline_mode<synchronous>, transform_indices = @transform_5, window_bounds = array<i64: 1, 32>}, {pipeline_mode = #tpu.pipeline_mode<synchronous>, transform_indices = @transform_6, window_bounds = array<i64: 32, 1>}, {transform_indices = @transform_7, window_bounds = array<i64: 1, 1, 12>}, {transform_indices = @transform_8, window_bounds = array<i64: 1, 12, 32>}]} {
    %c0 = arith.constant 0 : index
    %c0_0 = arith.constant 0 : index
    %c0_1 = arith.constant 0 : index
    %0 = vector.load %arg3[%c0, %c0_0, %c0_1] : memref<1x12x1xf32, #tpu.memory_space<vmem>>, vector<1x12x1xf32>
    %1 = vector.shape_cast %0 : vector<1x12x1xf32> to vector<12x1xf32>
    %c0_2 = arith.constant 0 : index
    %c0_3 = arith.constant 0 : index
    %2 = vector.load %arg4[%c0_2, %c0_3] : memref<12x12xf32, #tpu.memory_space<vmem>>, vector<12x12xf32>
    %c0_4 = arith.constant 0 : index
    %c0_5 = arith.constant 0 : index
    %c0_6 = arith.constant 0 : index
    %3 = vector.load %arg1[%c0_4, %c0_5, %c0_6] : memref<1x12x32xf32, #tpu.memory_space<vmem>>, vector<1x12x32xf32>
    %4 = vector.shape_cast %3 : vector<1x12x32xf32> to vector<12x32xf32>
    %c0_7 = arith.constant 0 : index
    %c0_8 = arith.constant 0 : index
    %c0_9 = arith.constant 0 : index
    %5 = vector.load %arg2[%c0_7, %c0_8, %c0_9] : memref<1x12x12xf32, #tpu.memory_space<vmem>>, vector<1x12x12xf32>
    %6 = vector.shape_cast %5 : vector<1x12x12xf32> to vector<12x12xf32>
    %c0_10 = arith.constant 0 : index
    %c0_11 = arith.constant 0 : index
    %7 = vector.load %arg5[%c0_10, %c0_11] : memref<32x32xf32, #tpu.memory_space<vmem>>, vector<32x32xf32>
    %c0_12 = arith.constant 0 : index
    %c0_13 = arith.constant 0 : index
    %8 = vector.load %arg6[%c0_12, %c0_13] : memref<1x32xf32, #tpu.memory_space<vmem>>, vector<1x32xf32>
    %cst = arith.constant dense<0.000000e+00> : vector<12x32xf32>
    %9 = tpu.matmul %6, %4, %cst {dimension_numbers = #tpu.dot_dimension_numbers<[1], [0], [0], [1], [0, 0, 1, 1], [], []>} : vector<12x12xf32>, vector<12x32xf32>, vector<12x32xf32> -> vector<12x32xf32>
    %cst_14 = arith.constant dense<0.000000e+00> : vector<12x32xf32>
    %10 = tpu.matmul %9, %7, %cst_14 {dimension_numbers = #tpu.dot_dimension_numbers<[1], [0], [0], [1], [0, 0, 1, 1], [], []>} : vector<12x32xf32>, vector<32x32xf32>, vector<12x32xf32> -> vector<12x32xf32>
    %11 = vector.broadcast %8 : vector<1x32xf32> to vector<12x32xf32>
    %12 = arith.addf %10, %11 : vector<12x32xf32>
    %cst_15 = arith.constant 0.000000e+00 : f32
    %13 = vector.broadcast %cst_15 : f32 to vector<12x32xf32>
    %14 = arith.maximumf %12, %13 : vector<12x32xf32>
    %15 = vector.broadcast %1 : vector<12x1xf32> to vector<12x32xf32>
    %16 = arith.mulf %15, %14 : vector<12x32xf32>
    %c0_16 = arith.constant 0 : index
    %c0_17 = arith.constant 0 : index
    %17 = vector.load %arg7[%c0_16, %c0_17] : memref<32x1xf32, #tpu.memory_space<vmem>>, vector<32x1xf32>
    %cst_18 = arith.constant dense<0.000000e+00> : vector<12x1xf32>
    %18 = tpu.matmul %16, %17, %cst_18 {dimension_numbers = #tpu.dot_dimension_numbers<[1], [0], [0], [1], [0, 0, 1, 1], [], []>} : vector<12x32xf32>, vector<32x1xf32>, vector<12x1xf32> -> vector<12x1xf32>
    %cst_19 = arith.constant 1.000000e+00 : f32
    %19 = vector.broadcast %cst_19 : f32 to vector<12x1xf32>
    %20 = arith.subf %1, %19 : vector<12x1xf32>
    %cst_20 = arith.constant 1.000000e+10 : f32
    %21 = vector.broadcast %cst_20 : f32 to vector<12x1xf32>
    %22 = arith.mulf %20, %21 : vector<12x1xf32>
    %23 = arith.addf %18, %22 : vector<12x1xf32>
    %cst_21 = arith.constant dense<0xFF800000> : vector<1xf32>
    %24 = vector.multi_reduction <maximumf>, %23, %cst_21 [0] : vector<12x1xf32> to vector<1xf32>
    %25 = vector.shape_cast %24 : vector<1xf32> to vector<1x1xf32>
    %26 = vector.broadcast %25 : vector<1x1xf32> to vector<12x1xf32>
    %27 = arith.subf %23, %26 : vector<12x1xf32>
    %cst_22 = arith.constant 1.000000e+00 : f32
    %28 = vector.broadcast %cst_22 : f32 to vector<12x1xf32>
    %29 = arith.mulf %27, %28 : vector<12x1xf32>
    %30 = math.exp %29 : vector<12x1xf32>
    %cst_23 = arith.constant dense<0.000000e+00> : vector<12x1xf32>
    %31 = tpu.matmul %6, %30, %cst_23 {dimension_numbers = #tpu.dot_dimension_numbers<[1], [0], [0], [1], [0, 0, 1, 1], [], []>} : vector<12x12xf32>, vector<12x1xf32>, vector<12x1xf32> -> vector<12x1xf32>
    %cst_24 = arith.constant 1.000000e-10 : f32
    %32 = vector.broadcast %cst_24 : f32 to vector<12x1xf32>
    %33 = arith.addf %31, %32 : vector<12x1xf32>
    %34 = arith.mulf %6, %2 : vector<12x12xf32>
    %cst_25 = arith.constant dense<0.000000e+00> : vector<12xf32>
    %35 = vector.multi_reduction <add>, %34, %cst_25 [1] : vector<12x12xf32> to vector<12xf32>
    %36 = vector.shape_cast %35 : vector<12xf32> to vector<12x1xf32>
    %cst_26 = arith.constant dense<0.000000e+00> : vector<12xf32>
    %37 = vector.multi_reduction <add>, %6, %cst_26 [1] : vector<12x12xf32> to vector<12xf32>
    %38 = vector.shape_cast %37 : vector<12xf32> to vector<12x1xf32>
    %39 = arith.mulf %30, %36 : vector<12x1xf32>
    %40 = arith.divf %39, %33 : vector<12x1xf32>
    %41 = arith.mulf %40, %38 : vector<12x1xf32>
    %42 = arith.mulf %41, %1 : vector<12x1xf32>
    %43 = vector.broadcast %42 : vector<12x1xf32> to vector<12x32xf32>
    %44 = arith.mulf %43, %16 : vector<12x32xf32>
    %c0_27 = arith.constant 0 : index
    %c0_28 = arith.constant 0 : index
    %c0_29 = arith.constant 0 : index
    %45 = vector.load %arg9[%c0_27, %c0_28, %c0_29] : memref<1x12x32xf32, #tpu.memory_space<vmem>>, vector<1x12x32xf32>
    %46 = vector.shape_cast %45 : vector<1x12x32xf32> to vector<12x32xf32>
    %47 = vector.shape_cast %44 : vector<12x32xf32> to vector<1x12x32xf32>
    tpu.vector_store %arg9[%c0_27, %c0_28, %c0_29], %47 {strides = array<i32>} : memref<1x12x32xf32, #tpu.memory_space<vmem>>, vector<1x12x32xf32>,
    %48 = vector.broadcast %42 : vector<12x1xf32> to vector<12x12xf32>
    %49 = arith.mulf %2, %48 : vector<12x12xf32>
    %cst_30 = arith.constant dense<0.000000e+00> : vector<12xf32>
    %50 = vector.multi_reduction <add>, %49, %cst_30 [0] : vector<12x12xf32> to vector<12xf32>
    %51 = vector.shape_cast %50 : vector<12xf32> to vector<1x12xf32>
    %c0_31 = arith.constant 0 : index
    %c0_32 = arith.constant 0 : index
    %c0_33 = arith.constant 0 : index
    %52 = vector.load %arg8[%c0_31, %c0_32, %c0_33] : memref<1x1x12xf32, #tpu.memory_space<vmem>>, vector<1x1x12xf32>
    %53 = vector.shape_cast %52 : vector<1x1x12xf32> to vector<1x12xf32>
    %54 = vector.shape_cast %51 : vector<1x12xf32> to vector<1x1x12xf32>
    tpu.vector_store %arg8[%c0_31, %c0_32, %c0_33], %54 {strides = array<i32>} : memref<1x1x12xf32, #tpu.memory_space<vmem>>, vector<1x1x12xf32>,
    return
  }
  func.func @transform_0(%arg0: i32) -> (i32, i32, i32) {
    %c0_i32 = arith.constant 0 : i32
    %c0_i32_0 = arith.constant 0 : i32
    %c0_i32_1 = arith.constant 0 : i32
    return %arg0, %c0_i32, %c0_i32_0 : i32, i32, i32
  }
  func.func @transform_1(%arg0: i32) -> (i32, i32, i32) {
    %c0_i32 = arith.constant 0 : i32
    %c0_i32_0 = arith.constant 0 : i32
    %c0_i32_1 = arith.constant 0 : i32
    return %arg0, %c0_i32, %c0_i32_0 : i32, i32, i32
  }
  func.func @transform_2(%arg0: i32) -> (i32, i32, i32) {
    %c0_i32 = arith.constant 0 : i32
    %c0_i32_0 = arith.constant 0 : i32
    %c0_i32_1 = arith.constant 0 : i32
    return %arg0, %c0_i32, %c0_i32_0 : i32, i32, i32
  }
  func.func @transform_3(%arg0: i32) -> (i32, i32) {
    %c0_i32 = arith.constant 0 : i32
    %c0_i32_0 = arith.constant 0 : i32
    %c0_i32_1 = arith.constant 0 : i32
    return %c0_i32, %c0_i32_0 : i32, i32
  }
  func.func @transform_4(%arg0: i32) -> (i32, i32) {
    %c0_i32 = arith.constant 0 : i32
    %c0_i32_0 = arith.constant 0 : i32
    %c0_i32_1 = arith.constant 0 : i32
    return %c0_i32, %c0_i32_0 : i32, i32
  }
  func.func @transform_5(%arg0: i32) -> (i32, i32) {
    %c0_i32 = arith.constant 0 : i32
    %c0_i32_0 = arith.constant 0 : i32
    %c0_i32_1 = arith.constant 0 : i32
    return %c0_i32, %c0_i32_0 : i32, i32
  }
  func.func @transform_6(%arg0: i32) -> (i32, i32) {
    %c0_i32 = arith.constant 0 : i32
    %c0_i32_0 = arith.constant 0 : i32
    %c0_i32_1 = arith.constant 0 : i32
    return %c0_i32, %c0_i32_0 : i32, i32
  }
  func.func @transform_7(%arg0: i32) -> (i32, i32, i32) {
    %c0_i32 = arith.constant 0 : i32
    %c0_i32_0 = arith.constant 0 : i32
    %c0_i32_1 = arith.constant 0 : i32
    return %arg0, %c0_i32, %c0_i32_0 : i32, i32, i32
  }
  func.func @transform_8(%arg0: i32) -> (i32, i32, i32) {
    %c0_i32 = arith.constant 0 : i32
    %c0_i32_0 = arith.constant 0 : i32
    %c0_i32_1 = arith.constant 0 : i32
    return %arg0, %c0_i32, %c0_i32_0 : i32, i32, i32
  }
}

module attributes {stable_mosaic.version = 11 : i64} {
  func.func @_pool_kernel(%arg0: i32, %arg1: memref<1x9x1xi32, #tpu.memory_space<vmem>>, %arg2: memref<1x9x1xf32, #tpu.memory_space<vmem>>, %arg3: memref<1x12x32xf32, #tpu.memory_space<vmem>>, %arg4: memref<1x12x12xf32, #tpu.memory_space<vmem>>, %arg5: memref<1x9x32xf32, #tpu.memory_space<vmem>>, %arg6: memref<1x9x9xf32, #tpu.memory_space<vmem>>) attributes {dimension_semantics = [#tpu.dimension_semantics<parallel>], iteration_bounds = array<i64: 2>, scalar_prefetch = 0 : i64, scratch_operands = 0 : i64, tpu.core_type = #tpu.core_type<tc>, window_params = [{transform_indices = @transform_0, window_bounds = array<i64: 1, 9, 1>}, {transform_indices = @transform_1, window_bounds = array<i64: 1, 9, 1>}, {transform_indices = @transform_2, window_bounds = array<i64: 1, 12, 32>}, {transform_indices = @transform_3, window_bounds = array<i64: 1, 12, 12>}, {transform_indices = @transform_4, window_bounds = array<i64: 1, 9, 32>}, {transform_indices = @transform_5, window_bounds = array<i64: 1, 9, 9>}]} {
    %c0 = arith.constant 0 : index
    %c0_0 = arith.constant 0 : index
    %c0_1 = arith.constant 0 : index
    %0 = vector.load %arg1[%c0, %c0_0, %c0_1] : memref<1x9x1xi32, #tpu.memory_space<vmem>>, vector<1x9x1xi32>
    %1 = vector.shape_cast %0 : vector<1x9x1xi32> to vector<9x1xi32>
    %c0_2 = arith.constant 0 : index
    %c0_3 = arith.constant 0 : index
    %c0_4 = arith.constant 0 : index
    %2 = vector.load %arg2[%c0_2, %c0_3, %c0_4] : memref<1x9x1xf32, #tpu.memory_space<vmem>>, vector<1x9x1xf32>
    %3 = vector.shape_cast %2 : vector<1x9x1xf32> to vector<9x1xf32>
    %c0_5 = arith.constant 0 : index
    %c0_6 = arith.constant 0 : index
    %c0_7 = arith.constant 0 : index
    %4 = vector.load %arg3[%c0_5, %c0_6, %c0_7] : memref<1x12x32xf32, #tpu.memory_space<vmem>>, vector<1x12x32xf32>
    %5 = vector.shape_cast %4 : vector<1x12x32xf32> to vector<12x32xf32>
    %c0_8 = arith.constant 0 : index
    %c0_9 = arith.constant 0 : index
    %c0_10 = arith.constant 0 : index
    %6 = vector.load %arg4[%c0_8, %c0_9, %c0_10] : memref<1x12x12xf32, #tpu.memory_space<vmem>>, vector<1x12x12xf32>
    %7 = vector.shape_cast %6 : vector<1x12x12xf32> to vector<12x12xf32>
    %8 = tpu.iota {dimensions = array<i32: 1>} : vector<9x12xi32>
    %9 = vector.broadcast %1 : vector<9x1xi32> to vector<9x12xi32>
    %10 = arith.cmpi eq, %8, %9 : vector<9x12xi32>
    %cst = arith.constant 0.000000e+00 : f32
    %11 = vector.shape_cast %3 : vector<9x1xf32> to vector<9x1xf32>
    %12 = vector.broadcast %11 : vector<9x1xf32> to vector<9x12xf32>
    %13 = vector.broadcast %cst : f32 to vector<9x12xf32>
    %14 = arith.select %10, %12, %13 : vector<9x12xi1>, vector<9x12xf32>
    %cst_11 = arith.constant dense<0.000000e+00> : vector<9x12xf32>
    %15 = tpu.matmul %14, %7, %cst_11 {dimension_numbers = #tpu.dot_dimension_numbers<[1], [0], [0], [1], [0, 0, 1, 1], [], []>} : vector<9x12xf32>, vector<12x12xf32>, vector<9x12xf32> -> vector<9x12xf32>
    %cst_12 = arith.constant dense<0.000000e+00> : vector<12xf32>
    %16 = vector.multi_reduction <add>, %15, %cst_12 [0] : vector<9x12xf32> to vector<12xf32>
    %17 = vector.shape_cast %16 : vector<12xf32> to vector<1x12xf32>
    %cst_13 = arith.constant 1.000000e-10 : f32
    %18 = vector.broadcast %cst_13 : f32 to vector<1x12xf32>
    %19 = arith.addf %17, %18 : vector<1x12xf32>
    %20 = vector.broadcast %19 : vector<1x12xf32> to vector<9x12xf32>
    %21 = arith.divf %15, %20 : vector<9x12xf32>
    %cst_14 = arith.constant dense<0.000000e+00> : vector<9x32xf32>
    %22 = tpu.matmul %21, %5, %cst_14 {dimension_numbers = #tpu.dot_dimension_numbers<[1], [0], [0], [1], [0, 0, 1, 1], [], []>} : vector<9x12xf32>, vector<12x32xf32>, vector<9x32xf32> -> vector<9x32xf32>
    %c0_15 = arith.constant 0 : index
    %c0_16 = arith.constant 0 : index
    %c0_17 = arith.constant 0 : index
    %23 = vector.load %arg5[%c0_15, %c0_16, %c0_17] : memref<1x9x32xf32, #tpu.memory_space<vmem>>, vector<1x9x32xf32>
    %24 = vector.shape_cast %23 : vector<1x9x32xf32> to vector<9x32xf32>
    %25 = vector.shape_cast %22 : vector<9x32xf32> to vector<1x9x32xf32>
    tpu.vector_store %arg5[%c0_15, %c0_16, %c0_17], %25 {strides = array<i32>} : memref<1x9x32xf32, #tpu.memory_space<vmem>>, vector<1x9x32xf32>,
    %cst_18 = arith.constant dense<0.000000e+00> : vector<9x12xf32>
    %26 = tpu.matmul %21, %7, %cst_18 {dimension_numbers = #tpu.dot_dimension_numbers<[1], [0], [0], [1], [0, 0, 1, 1], [], []>} : vector<9x12xf32>, vector<12x12xf32>, vector<9x12xf32> -> vector<9x12xf32>
    %cst_19 = arith.constant dense<0.000000e+00> : vector<9x9xf32>
    %27 = tpu.matmul %26, %21, %cst_19 {dimension_numbers = #tpu.dot_dimension_numbers<[1], [1], [0], [0], [0, 0, 1, 0], [], []>} : vector<9x12xf32>, vector<9x12xf32>, vector<9x9xf32> -> vector<9x9xf32>
    %c0_20 = arith.constant 0 : index
    %c0_21 = arith.constant 0 : index
    %c0_22 = arith.constant 0 : index
    %28 = vector.load %arg6[%c0_20, %c0_21, %c0_22] : memref<1x9x9xf32, #tpu.memory_space<vmem>>, vector<1x9x9xf32>
    %29 = vector.shape_cast %28 : vector<1x9x9xf32> to vector<9x9xf32>
    %30 = vector.shape_cast %27 : vector<9x9xf32> to vector<1x9x9xf32>
    tpu.vector_store %arg6[%c0_20, %c0_21, %c0_22], %30 {strides = array<i32>} : memref<1x9x9xf32, #tpu.memory_space<vmem>>, vector<1x9x9xf32>,
    return
  }
  func.func @transform_0(%arg0: i32) -> (i32, i32, i32) {
    %c0_i32 = arith.constant 0 : i32
    %c0_i32_0 = arith.constant 0 : i32
    %c0_i32_1 = arith.constant 0 : i32
    return %arg0, %c0_i32, %c0_i32_0 : i32, i32, i32
  }
  func.func @transform_1(%arg0: i32) -> (i32, i32, i32) {
    %c0_i32 = arith.constant 0 : i32
    %c0_i32_0 = arith.constant 0 : i32
    %c0_i32_1 = arith.constant 0 : i32
    return %arg0, %c0_i32, %c0_i32_0 : i32, i32, i32
  }
  func.func @transform_2(%arg0: i32) -> (i32, i32, i32) {
    %c0_i32 = arith.constant 0 : i32
    %c0_i32_0 = arith.constant 0 : i32
    %c0_i32_1 = arith.constant 0 : i32
    return %arg0, %c0_i32, %c0_i32_0 : i32, i32, i32
  }
  func.func @transform_3(%arg0: i32) -> (i32, i32, i32) {
    %c0_i32 = arith.constant 0 : i32
    %c0_i32_0 = arith.constant 0 : i32
    %c0_i32_1 = arith.constant 0 : i32
    return %arg0, %c0_i32, %c0_i32_0 : i32, i32, i32
  }
  func.func @transform_4(%arg0: i32) -> (i32, i32, i32) {
    %c0_i32 = arith.constant 0 : i32
    %c0_i32_0 = arith.constant 0 : i32
    %c0_i32_1 = arith.constant 0 : i32
    return %arg0, %c0_i32, %c0_i32_0 : i32, i32, i32
  }
  func.func @transform_5(%arg0: i32) -> (i32, i32, i32) {
    %c0_i32 = arith.constant 0 : i32
    %c0_i32_0 = arith.constant 0 : i32
    %c0_i32_1 = arith.constant 0 : i32
    return %arg0, %c0_i32, %c0_i32_0 : i32, i32, i32
  }
}

</mosaic_0001>

<bundles_post_ra>
// kernel: classifier_forward.5
= control target key start
LH: loop header
LB: loop body
LE: loop exit
PB: predicated region body
PF: predicated region fallthrough
CT: control target
= control target key end

     0   :  { %s685_s18 = smov 0   ;;  %s733_s0 = inlined_call_operand.vmem [shape: s32[2,12,1], index: 0, kind: input, shape index: {}]   ;;  %s734_s1 = inlined_call_operand.vmem [shape: f32[2,12,1], index: 1, kind: input, shape index: {}]   ;;  %s735_s2 = inlined_call_operand.vmem [shape: f32[2,16,32], index: 2, kind: input, shape index: {}]   ;;  %s736_s3 = inlined_call_operand.vmem [shape: f32[2,16,16], index: 3, kind: input, shape index: {}]   ;;  %s737_s4 = inlined_call_operand.vmem [shape: f32[2,12,32], index: 4, kind: output, shape index: {0}]   ;;  %s738_s5 = inlined_call_operand.vmem [shape: f32[2,12,12], index: 5, kind: output, shape index: {1}]  }
   0x1 LB: > { %s598_s19 = sadd.s32 4294967295, %s652_s18   ;;  %p602_p0 = scmp.ge.s32.totalorder %s652_s18, 1  ;;  %s652_s18 = sphi %s685_s18, %s16_s18  }
   0x2   : > { %p220_p1 = scmp.lt.s32.totalorder %s652_s18, 3 }
   0x4   : > { %p221_p2 = pnand %p602_p0, %p220_p1 }
   0x5   : > { %p268_p3 = scmp.lt.s32.totalorder (!%p221_p2), %s598_s19, 1 }
   0x6   : > { %224 = sbr.rel (%p221_p2) target bundleno = 582 (0x246), region = 36 }
   0xb   : > { %v654_v0 = vmov 0   ;;  %s740_s19 = smov (!%p268_p3, %s598_s19), 1  ;;  %v306_v7 = vlaneseq  ;;  %vm328_vm0 = vcmask 130048   ;;  %vm359_vm3 = vcmask 125952  }
   0xc   : > { %643 = vset.pattern.permute.xlu1 %v654_v0  ;;  %642 = vset.pattern.permute.xlu0 %v654_v0  ;;  %s693_s20 = sshll.u32 %s740_s19, 4  ;;  %vm414_vm8 = vcmask 261120   ;;  %vm416_vm9 = vcmask 257024   ;;  %vm470_vm10 = vcmask 97280   ;;  %vm472_vm11 = vcmask 93184  }
   0xd   : > { %s272_s23 = scalar_lea.vmem %s733_s0, %s693_s20  ;;  %s277_s26 = scalar_lea.vmem %s734_s1, %s693_s20  ;;  %v307_v9 = vand.u32 127, %v306_v7 }
   0xe   : > { %v299_v1 = vld [vmem:[%s272_s23 + $0x8] sm:$0xf]  ;;  %v298_v2 = vld [vmem:[%s272_s23] sm:$0xff]  ;;  %s287_s29 = scalar_lea.vmem %s736_s3, %s693_s20  ;;  %s282_s7 = scalar_lea.vmem %s735_s2, %s693_s20 }
   0xf   : > { %312 = vperm.xlu1 %643, %v299_v1   ;;  %309 = vperm.xlu0 %642, %v298_v2   ;;  %v301_v3 = vld [vmem:[%s277_s26 + $0x8] sm:$0xf]  ;;  %v300_v4 = vld [vmem:[%s277_s26] sm:$0xff]  ;;  %s292_s10 = scalar_lea.vmem %s737_s4, %s693_s20  ;;  %s297_s13 = scalar_lea.vmem %s738_s5, %s693_s20 }
  0x10   : > { %v305_v5 = vld [vmem:[%s287_s29 + $0x8] sm:$0xff]  ;;  %v304_v6 = vld [vmem:[%s287_s29] sm:$0xff] }
  0x11   : > { %349 = vmatpush.msra.mxu0 %v305_v5  ;;  %432 = vmatpush.msra.mxu2 %v305_v5  ;;  %v303_v19 = vld [vmem:[%s282_s7 + $0x8] sm:$0xff]  ;;  %v302_v21 = vld [vmem:[%s282_s7] sm:$0xff] }
  0x12   : > { %405 = vmatpush.msra.mxu1 %v303_v19 }
  0x13   : > { %350 = vmatpush.msra.mxu0 %v304_v6  ;;  %433 = vmatpush.msra.mxu2 %v304_v6 }
  0x14   : > { %406 = vmatpush.msra.mxu1 %v302_v21 }
  0x17   : > { %323 = vperm.xlu1 %643, %v301_v3   ;;  %318 = vperm.xlu0 %642, %v300_v4  }
  0x81   : > { %v310_v8 = vpop.permute.xlu0 %309  ;;  %v313_v10 = vpop.permute.xlu1 %312 }
  0x82   : > { %vm314_vm1 = vcmp.eq.s32.totalorder %v307_v9, %v310_v8  ;;  %vm315_vm2 = vcmp.eq.s32.totalorder %v307_v9, %v313_v10 }
  0x89   : > { %v319_v11 = vpop.permute.xlu0 %318  ;;  %v324_v13 = vpop.permute.xlu1 %323 }
  0x8a   : > { %v326_v12 = vsel %vm314_vm1, %v319_v11, 0.0  ;;  %v327_v14 = vsel %vm315_vm2, %v324_v13, 0.0 }
  0x8b   : > { %615 = vmatmul.msk.f32.vlgmr.msra.gmra.mxu0 %vm328_vm0, %v326_v12 }
  0x93   : > { %616 = vmatmul.msk.f32.gmra.mxu0 %vm328_vm0, %v327_v14 }
 0x108   : > { %v352_v15 = vpop.f32.mrf.mxu0 }
 0x109   : > { %v358_v17 = vsel %vm328_vm0, %v352_v15, 0.0 }
 0x110   : > { %v355_v16 = vpop.f32.mrf.mxu0 }
 0x111   : > { %v360_v18 = vsel %vm359_vm3, %v355_v16, 0.0 }
 0x112   : > { %v361_v20 = vadd.f32 %v360_v18, %v358_v17 }
 0x114   : > { %v362_v22 = vrot.slane %v361_v20, 4 }
 0x116   : > { %v363_v23 = vadd.f32 %v362_v22, %v361_v20 }
 0x118   : > { %v364_v24 = vrot.slane %v363_v23, 2 }
 0x11a   : > { %v365_v25 = vadd.f32 %v364_v24, %v363_v23 }
 0x11c   : > { %v366_v26 = vrot.slane %v365_v25, 1 }
 0x11e   : > { %v367_v27 = vadd.f32 %v366_v26, %v365_v25 }
 0x120   : > { %v368_v28 = vadd.f32 1e-10, %v367_v27 }
 0x122   : > { %644 = vrcp.f32 %v368_v28  ;;  %v380_v32 = vand.u32 2147483648, %v368_v28  ;;  %v378_v34 = vand.u32 2147483647, %v368_v28  ;;  %vm374_vm5 = vweird.f32 %v368_v28 }
 0x124   : > { %v381_v36 = vor.u32 1.1754944e-38, %v380_v32  ;;  %vm379_vm7 = vcmp.eq.f32.partialorder %v378_v34, 8.507059e+37 }
 0x128   : > { %v645_v29 = vpop.eup %644 }
 0x129   : > { %v370_v30 = vmul.f32 %v645_v29, %v368_v28  ;;  %vm375_vm4 = vweird.f32 %v645_v29 }
 0x12a   : > { %vm376_vm6 = vmor %vm374_vm5, %vm375_vm4 }
 0x12b   : > { %v371_v31 = vsub.f32 1.0, %v370_v30 }
 0x12d   : > { %v372_v33 = vmul.f32 %v645_v29, %v371_v31 }
 0x12f   : > { %v373_v35 = vadd.f32 %v645_v29, %v372_v33 }
 0x131   : > { %v377_v37 = vsel %vm376_vm6, %v645_v29, %v373_v35 }
 0x132   : > { %v382_v38 = vsel %vm379_vm7, %v381_v36, %v377_v37 }
 0x133   : > { %v383_v39 = vmul.f32 %v382_v38, %v352_v15  ;;  %v384_v40 = vmul.f32 %v382_v38, %v355_v16 }
 0x135   : > { %617 = vmatmul.msk.f32.vlgmr.msra.gmra.mxu1 %vm328_vm0, %v383_v39  ;;  %619 = vmatmul.msk.f32.vlgmr.msra.gmra.mxu2 %vm328_vm0, %v383_v39 }
 0x136   : > { %621 = vmatpush.xpose.msk.msra.mxu3 %vm328_vm0, %v384_v40 }
 0x13a   : > { %622 = vmatpush.xpose.msk.msra.mxu3 %vm328_vm0, %v383_v39 }
 0x13d   : > { %618 = vmatmul.msk.f32.gmra.mxu1 %vm328_vm0, %v384_v40  ;;  %620 = vmatmul.msk.f32.gmra.mxu2 %vm328_vm0, %v384_v40 }
 0x1b2   : > { %v408_v41 = vpop.f32.mrf.mxu1 }
 0x1b3   : > { %415 = vst.msk [vmem:[%s292_s10] sm:$0xff] %vm414_vm8, %v408_v41 }
 0x1b8   : > { %v435_v42 = vpop.f32.mrf.mxu2 }
 0x1b9   : > { %623 = vmatmul.msk.f32.vlgmr.msra.gmra.mxu3 %vm328_vm0, %v435_v42 }
 0x1ba   : > { %v411_v43 = vpop.f32.mrf.mxu1 }
 0x1bb   : > { %417 = vst.msk [vmem:[%s292_s10 + $0x8] sm:$0xf] %vm416_vm9, %v411_v43 }
 0x1c0   : > { %v438_v44 = vpop.f32.mrf.mxu2 }
 0x1c1   : > { %624 = vmatmul.msk.f32.gmra.mxu3 %vm328_vm0, %v438_v44 }
 0x23c   : > { %v464_v45 = vpop.f32.mrf.mxu3 }
 0x23d   : > { %471 = vst.msk [vmem:[%s297_s13] sm:$0xff] %vm470_vm10, %v464_v45 }
 0x244   : > { %v467_v46 = vpop.f32.mrf.mxu3 }
 0x245   : > { %473 = vst.msk [vmem:[%s297_s13 + $0x8] sm:$0xf] %vm472_vm11, %v467_v46 }
 0x246 PF: > { %s16_s18 = sadd.s32 1, %s652_s18  }
 0x247   : > { %p13_p4 = scmp.ge.s32.totalorder %s16_s18, 4  }
 0x249   :  { %15 = sbr.rel (!%p13_p4) target bundleno = 1 (0x1), region = 87 }

// kernel: classifier_forward.4
= control target key start
LH: loop header
LB: loop body
LE: loop exit
PB: predicated region body
PF: predicated region fallthrough
CT: control target
= control target key end

     0   :  { %18 = vsyncpa [#allocation3], 0  ;;  %s1662_s0 = inlined_call_operand.vmem [shape: f32[2,16,32], index: 0, kind: input, shape index: {}]   ;;  %s1663_s1 = inlined_call_operand.vmem [shape: f32[2,16,1], index: 1, kind: input, shape index: {}]   ;;  %s1664_s2 = inlined_call_operand.vmem [shape: f32[16,16], index: 2, kind: input, shape index: {}]   ;;  %s1665_s3 = inlined_call_operand.vmem [shape: f32[32,32], index: 3, kind: input, shape index: {}]   ;;  %s1666_s4 = inlined_call_operand.vmem [shape: f32[1,32], index: 4, kind: input, shape index: {}, may-alias: {4,6,8}]   ;;  %s1667_s5 = inlined_call_operand.hbm [shape: f32[32,32], index: 5, kind: input, shape index: {}]   ;;  %s1668_s6 = inlined_call_operand.vmem [shape: f32[1,32], index: 6, kind: input, shape index: {}, may-alias: {4,6,8}]   ;;  %s1669_s7 = inlined_call_operand.hbm [shape: f32[32,32], index: 7, kind: input, shape index: {}]   ;;  %s1670_s8 = inlined_call_operand.vmem [shape: f32[1,32], index: 8, kind: input, shape index: {}, may-alias: {4,6,8}]   ;;  %s1671_s9 = inlined_call_operand.hbm [shape: f32[32,1], index: 9, kind: input, shape index: {}]   ;;  %s1672_s10 = inlined_call_operand.vmem [shape: f32[2,16,16], index: 10, kind: output, shape index: {0}]   ;;  %s1673_s11 = inlined_call_operand.vmem [shape: f32[2,1,16], index: 11, kind: output, shape index: {1}]   ;;  %s1674_s12 = inlined_call_operand.vmem [shape: f32[2,16,32], index: 12, kind: output, shape index: {2}]  }
   0x1   :  { %19 = vsyncpa [#allocation5], 0  ;;  %s1480_s21 = smov 0  }
   0x2 LB: > { %s1486_s22 = sadd.s32 4294967295, %s1407_s21   ;;  %p1182_p0 = scmp.ge.s32.totalorder %s1407_s21, 1  ;;  %s1407_s21 = sphi %s1480_s21, %s25_s21  }
   0x3   : > { %p328_p1 = scmp.lt.s32.totalorder %s1407_s21, 3  ;;  %p1251_p2 = scmp.eq.s32.totalorder %s1486_s22, 0 }
   0x4   : > { %s365_s25 = sshll.u32 %s1669_s7, 4  ;;  %s348_s29 = sshll.u32 %s1667_s5, 4  ;;  %s366_s25 = int_to_ptr.hbm [resolvable:$true] %s365_s25  ;;  %s349_s29 = int_to_ptr.hbm [resolvable:$true] %s348_s29 }
   0x5   : > { %p1494_p3 = pnand %p1182_p0, %p328_p1  ;;  %s1409_s30 = smov [#allocation4]  }
   0x6   : > { %s367_s13 = sshll.u32 %s1409_s30, 4  ;;  %s1410_s14 = smov [#allocation2]   ;;  %s368_s13 = int_to_ptr.vmem [resolvable:$true] %s367_s13 }
   0x7   : > { %p1241_p4 = pneg %p1494_p3  ;;  %s350_s15 = sshll.u32 %s1410_s14, 4  ;;  %s351_s15 = int_to_ptr.vmem [resolvable:$true] %s350_s15 }
   0x8   : > { %s382_s18 = sshll.u32 %s1671_s9, 4  ;;  %s1411_s19 = smov 128   ;;  %s383_s18 = int_to_ptr.hbm [resolvable:$true] %s382_s18 }
   0x9   : > { %p1242_p5 = pnand %p1251_p2, %p1241_p4  ;;  %s1412_s20 = smov 8  }
   0xa   : > { %s1413_s23 = smov [#allocation6]   ;;  %416 = sbr.rel (%p1494_p3) target bundleno = 1753 (0x6d9), region = 60 }
   0xb   : > { %1247 = dma.hbm_to_vmem [thread:$0]  (!%p1242_p5), %s366_s25, 512, %s368_s13, [#allocation5], %s1411_s19, %s1411_s19, %s1412_s20  }
   0xc   : > { %1244 = dma.hbm_to_vmem [thread:$0]  (!%p1242_p5), %s349_s29, 512, %s351_s15, [#allocation3], %s1411_s19, %s1411_s19, %s1412_s20  }
   0xd   : > { %s384_s24 = sshll.u32 %s1413_s23, 4  ;;  %s385_s24 = int_to_ptr.vmem [resolvable:$true] %s384_s24 }
   0xe   : > { %1250 = dma.hbm_to_vmem [thread:$0]  (!%p1242_p5), %s383_s18, 512, %s385_s24, [#allocation5], %s1411_s19, %s1411_s19, %s1412_s20  }
   0xf   : > { %1398 = dma.done.wait (%p1251_p2), [#allocation3], 512  }
  0x10   : > { %1400 = vsyncadd (%p1251_p2), [#allocation3], 4294966784 }
  0x11   : > { %1402 = dma.done.wait (%p1251_p2), [#allocation5], 1024  }
  0x12   : > { %1404 = vsyncadd (%p1251_p2), [#allocation5], 4294966272  ;;  %p482_p6 = scmp.lt.s32.totalorder %s1486_s22, 1  ;;  %vm513_vm0 = vcmask 261120   ;;  %vm611_vm13 = vcmask 130048   ;;  %v1414_v62 = vmov 0  }
  0x13   : > { %1271 = vset.pattern.permute.xlu2 %v1414_v62  ;;  %1272 = vset.pattern.permute.xlu1 %v1414_v62 }
  0x14   : > { %s1677_s22 = smov (!%p482_p6, %s1486_s22), 1  ;;  %1273 = vset.pattern.permute.xlu0 %v1414_v62 }
  0x15   : > { %s1523_s25 = sshll.u32 %s1677_s22, 4  ;;  %s499_s27 = scalar_lea.vmem %s1673_s11, %s1677_s22 }
  0x16   : > { %s486_s28 = scalar_lea.vmem %s1662_s0, %s1523_s25  ;;  %s491_s13 = scalar_lea.vmem %s1663_s1, %s1523_s25 }
  0x17   : > { %v510_v0 = vld [vmem:[%s486_s28 + $0x8] sm:$0xff]  ;;  %v1529_v2 = vld [vmem:[%s486_s28] sm:$0xff]  ;;  %s496_s16 = scalar_lea.vmem %s1672_s10, %s1523_s25  ;;  %s504_s24 = scalar_lea.vmem %s1674_s12, %s1523_s25 }
  0x18   : > { %v512_v1 = vmul.f32 %v510_v0, %v510_v0  ;;  %v511_v4 = vmul.f32 %v1529_v2, %v1529_v2  ;;  %v1547_v61 = vld [vmem:[%s491_s13] sm:$0xff] }
  0x19   : > { %861 = vperm.xlu2 %1271, %v1547_v61  }
  0x1a   : > { %v517_v3 = vsel %vm513_vm0, %v512_v1, 0.0  ;;  %v514_v5 = vsel %vm513_vm0, %v511_v4, 0.0  ;;  %v1552_v1 = vld [vmem:[%s491_s13 + $0x8] sm:$0xff] }
  0x1b   : > { %518 = vadd.xlane.f32.xlu0 %v517_v3 }
  0x21   : > { %866 = vperm.xlu2 %1271, %v1552_v1  }
  0x23   : > { %515 = vadd.xlane.f32.xlu0 %v514_v5 }
  0x8e   : > { %v519_v6 = vpop.xlane.xlu0 %518 }
  0x8f   : > { %1277 = vrsqrt.f32 %v519_v6  ;;  %vm539_vm1 = vcmp.eq.f32.partialorder %v519_v6, inf  ;;  %v542_v18 = vand.u32 2147483648, %v519_v6  ;;  %vm541_vm2 = vcmp.eq.f32.partialorder %v519_v6, 0.0 }
  0x95   : > { %v1278_v7 = vpop.eup %1277 }
  0x96   : > { %v533_v8 = vmul.f32 %v1278_v7, %v519_v6  ;;  %v516_v9 = vpop.xlane.xlu0 %515 }
  0x97   : > { %1279 = vrsqrt.f32 %v516_v9  ;;  %vm527_vm3 = vcmp.eq.f32.partialorder %v516_v9, inf  ;;  %v530_v26 = vand.u32 2147483648, %v516_v9  ;;  %vm529_vm4 = vcmp.eq.f32.partialorder %v516_v9, 0.0 }
  0x98   : > { %v534_v10 = vmul.f32 %v1278_v7, %v533_v8 }
  0x9a   : > { %v535_v11 = vmul.f32 0.5, %v534_v10 }
  0x9c   : > { %v536_v12 = vsub.f32 1.5, %v535_v11 }
  0x9d   : > { %v1280_v13 = vpop.eup %1279 }
  0x9e   : > { %v537_v14 = vmul.f32 %v1278_v7, %v536_v12  ;;  %v521_v15 = vmul.f32 %v1280_v13, %v516_v9 }
  0xa0   : > { %v538_v16 = vmul.f32 %v537_v14, %v519_v6  ;;  %v522_v17 = vmul.f32 %v1280_v13, %v521_v15 }
  0xa2   : > { %v540_v19 = vsel %vm539_vm1, %v519_v6, %v538_v16  ;;  %v523_v20 = vmul.f32 0.5, %v522_v17 }
  0xa3   : > { %v543_v21 = vsel %vm541_vm2, %v542_v18, %v540_v19 }
  0xa4   : > { %v545_v22 = vmax.f32 %v543_v21, 1e-12  ;;  %v524_v23 = vsub.f32 1.5, %v523_v20 }
  0xa6   : > { %1281 = vrcp.f32 %v545_v22  ;;  %v525_v24 = vmul.f32 %v1280_v13, %v524_v23  ;;  %v572_v33 = vand.u32 2147483648, %v545_v22  ;;  %v570_v35 = vand.u32 2147483647, %v545_v22 }
  0xa7   : > { %vm566_vm6 = vweird.f32 %v545_v22 }
  0xa8   : > { %v526_v25 = vmul.f32 %v525_v24, %v516_v9  ;;  %v573_v38 = vor.u32 1.1754944e-38, %v572_v33  ;;  %vm571_vm8 = vcmp.eq.f32.partialorder %v570_v35, 8.507059e+37 }
  0xaa   : > { %v528_v27 = vsel %vm527_vm3, %v516_v9, %v526_v25 }
  0xab   : > { %v531_v28 = vsel %vm529_vm4, %v530_v26, %v528_v27 }
  0xac   : > { %v1282_v29 = vpop.eup %1281  ;;  %v544_v30 = vmax.f32 %v531_v28, 1e-12 }
  0xad   : > { %v562_v31 = vmul.f32 %v1282_v29, %v545_v22  ;;  %vm567_vm5 = vweird.f32 %v1282_v29 }
  0xae   : > { %1283 = vrcp.f32 %v544_v30  ;;  %vm568_vm7 = vmor %vm566_vm6, %vm567_vm5  ;;  %v557_v44 = vand.u32 2147483648, %v544_v30  ;;  %v555_v46 = vand.u32 2147483647, %v544_v30  ;;  %vm551_vm10 = vweird.f32 %v544_v30 }
  0xaf   : > { %v563_v32 = vsub.f32 1.0, %v562_v31 }
  0xb0   : > { %v558_v48 = vor.u32 1.1754944e-38, %v557_v44  ;;  %vm556_vm12 = vcmp.eq.f32.partialorder %v555_v46, 8.507059e+37  ;;  %v670_v46 = vld [vmem:[%s1665_s3 + $0x18] sm:$0xff] }
  0xb1   : > { %v564_v34 = vmul.f32 %v1282_v29, %v563_v32  ;;  %v1562_v32 = vld [vmem:[%s1664_s2] sm:$0xff]  ;;  %722 = vmatpush.msra.mxu2 %v670_v46 }
  0xb3   : > { %v565_v36 = vadd.f32 %v1282_v29, %v564_v34 }
  0xb4   : > { %v1284_v37 = vpop.eup %1283 }
  0xb5   : > { %v569_v39 = vsel %vm568_vm7, %v1282_v29, %v565_v36  ;;  %v547_v40 = vmul.f32 %v1284_v37, %v544_v30  ;;  %vm552_vm9 = vweird.f32 %v1284_v37 }
  0xb6   : > { %v574_v41 = vsel %vm571_vm8, %v573_v38, %v569_v39  ;;  %vm553_vm11 = vmor %vm551_vm10, %vm552_vm9 }
  0xb7   : > { %v575_v42 = vmul.f32 %v574_v41, %v510_v0  ;;  %v548_v43 = vsub.f32 1.0, %v547_v40  ;;  %v1579_v41 = vld [vmem:[%s1664_s2 + $0x8] sm:$0xff] }
  0xb9   : > { %1199 = vmatpush.xpose.msk.msra.mxu0 %vm513_vm0, %v575_v42  ;;  %692 = vmatpush.msra.mxu1 %v575_v42  ;;  %v549_v45 = vmul.f32 %v1284_v37, %v548_v43 }
  0xba   : > { %1227 = vmatpush.msra.mxu3 %v575_v42 }
  0xbb   : > { %v550_v47 = vadd.f32 %v1284_v37, %v549_v45 }
  0xbd   : > { %v554_v49 = vsel %vm553_vm11, %v1284_v37, %v550_v47  ;;  %v669_v47 = vld [vmem:[%s1665_s3 + $0x10] sm:$0xff]  ;;  %vm908_vm11 = vcmask 7168  }
  0xbe   : > { %v559_v50 = vsel %vm556_vm12, %v558_v48, %v554_v49  ;;  %v668_v48 = vld [vmem:[%s1665_s3 + $0x8] sm:$0xff]  ;;  %723 = vmatpush.msra.mxu2 %v669_v47  ;;  %v667_v49 = vld [vmem:[%s1665_s3] sm:$0xff] }
  0xbf   : > { %v560_v51 = vmul.f32 %v559_v50, %v1529_v2 }
  0xc0   : > { %724 = vmatpush.msra.mxu2 %v668_v48 }
  0xc1   : > { %1200 = vmatpush.xpose.msk.msra.mxu0 %vm513_vm0, %v560_v51  ;;  %693 = vmatpush.msra.mxu1 %v560_v51 }
  0xc2   : > { %1228 = vmatpush.msra.mxu3 %v560_v51  ;;  %725 = vmatpush.msra.mxu2 %v667_v49 }
  0xc4   : > { %1201 = vmatmul.msk.f32.vlgmr.msra.gmra.mxu0 %vm513_vm0, %v560_v51 }
  0xcc   : > { %1202 = vmatmul.msk.f32.gmra.mxu0 %vm513_vm0, %v575_v42 }
 0x141   : > { %v599_v52 = vpop.f32.mrf.mxu0 }
 0x142   : > { %1285 = vtanh.f32 %v599_v52  ;;  %v738_v52 = vld [vmem:[#allocation2 + $0x18] sm:$0xff] }
 0x143   : > { %784 = vmatpush.msrb.mxu1 %v738_v52 }
 0x148   : > { %v1286_v53 = vpop.eup %1285 }
 0x149   : > { %v607_v54 = vmul.f32 0.5, %v1286_v53  ;;  %v602_v55 = vpop.f32.mrf.mxu0  ;;  %v737_v53 = vld [vmem:[#allocation2 + $0x10] sm:$0xff] }
 0x14a   : > { %1287 = vtanh.f32 %v602_v55  ;;  %785 = vmatpush.msrb.mxu1 %v737_v53 }
 0x14b   : > { %v609_v56 = vadd.f32 0.5, %v607_v54  ;;  %v736_v54 = vld [vmem:[#allocation2 + $0x8] sm:$0xff] }
 0x14c   : > { %786 = vmatpush.msrb.mxu1 %v736_v54 }
 0x14d   : > { %v612_v57 = vsel %vm611_vm13, %v609_v56, 0.0 }
 0x14e   : > { %613 = vadd.xlane.f32.xlu1 %v612_v57 }
 0x150   : > { %v1288_v58 = vpop.eup %1287 }
 0x151   : > { %v608_v59 = vmul.f32 0.5, %v1288_v58 }
 0x153   : > { %v1545_v60 = vadd.f32 0.5, %v608_v59 }
 0x155   : > { %v615_v63 = vsel %vm611_vm13, %v1545_v60, 0.0 }
 0x156   : > { %616 = vadd.xlane.f32.xlu1 %v615_v63  ;;  %v622_v0 = vadd.f32 %v615_v63, %v612_v57  ;;  %v735_v63 = vld [vmem:[#allocation2] sm:$0xff] }
 0x157   : > { %787 = vmatpush.msrb.mxu1 %v735_v63 }
 0x158   : > { %v623_v2 = vrot.slane %v622_v0, 4 }
 0x15a   : > { %v624_v3 = vadd.f32 %v623_v2, %v622_v0 }
 0x15c   : > { %v625_v4 = vrot.slane %v624_v3, 2 }
 0x15e   : > { %v626_v5 = vadd.f32 %v625_v4, %v624_v3  ;;  %v800_v3 = vld [vmem:[#allocation4 + $0x18] sm:$0xff]  ;;  %v799_v4 = vld [vmem:[#allocation4 + $0x10] sm:$0xff] }
 0x15f   : > { %846 = vmatpush.msrb.mxu0 %v800_v3 }
 0x160   : > { %v627_v6 = vrot.slane %v626_v5, 1 }
 0x161   : > { %847 = vmatpush.msrb.mxu0 %v799_v4 }
 0x162   : > { %v628_v7 = vadd.f32 %v627_v6, %v626_v5  ;;  %v798_v5 = vld [vmem:[#allocation4 + $0x8] sm:$0xff] }
 0x163   : > { %848 = vmatpush.msrb.mxu0 %v798_v5 }
 0x164   : > { %vm629_vm14 = vcmp.eq.f32.partialorder %v628_v7, 0.0 }
 0x165   : > { %v630_v8 = vsel %vm629_vm14, 1e-10, %v628_v7  ;;  %v1275_v7 = vld [vmem:[%s1668_s6] ss:$0 sm:$0xff] }
 0x166   : > { %1289 = vrsqrt.f32 %v630_v8  ;;  %vm659_vm6 = vweird.f32 %v630_v8 }
 0x16c   : > { %v1290_v9 = vpop.eup %1289 }
 0x16d   : > { %v654_v11 = vmul.f32 %v1290_v9, %v630_v8  ;;  %vm660_vm3 = vweird.f32 %v1290_v9 }
 0x16e   : > { %vm661_vm7 = vmor %vm659_vm6, %vm660_vm3  ;;  %vm1022_vm6 = vcmask 122880  }
 0x16f   : > { %v655_v13 = vmul.f32 %v1290_v9, %v654_v11 }
 0x171   : > { %v656_v16 = vmul.f32 0.5, %v655_v13  ;;  %v797_v13 = vld [vmem:[#allocation4] sm:$0xff] }
 0x172   : > { %849 = vmatpush.msrb.mxu0 %v797_v13 }
 0x173   : > { %v657_v20 = vsub.f32 1.5, %v656_v16  ;;  %v874_v16 = vld [vmem:[#allocation6 + $0x18] sm:$0xff] }
 0x174   : > { %897 = vmatpush.msrb.mxu2 %v874_v16 }
 0x175   : > { %v658_v25 = vmul.f32 %v1290_v9, %v657_v20  ;;  %v1276_v20 = vld [vmem:[%s1670_s8] ss:$0 sm:$0xff] }
 0x177   : > { %v662_v30 = vsel %vm661_vm7, %v1290_v9, %v658_v25 }
 0x1c1   : > { %v614_v10 = vpop.xlane.xlu1 %613 }
 0x1c2   : > { %vm618_vm15 = vcmp.eq.f32.partialorder %v614_v10, 0.0 }
 0x1c3   : > { %v620_v12 = vsel %vm618_vm15, 1e-10, %v614_v10 }
 0x1c4   : > { %1291 = vrsqrt.f32 %v620_v12  ;;  %vm637_vm4 = vweird.f32 %v620_v12 }
 0x1c9   : > { %v617_v14 = vpop.xlane.xlu1 %616 }
 0x1ca   : > { %v1292_v15 = vpop.eup %1291  ;;  %vm619_vm1 = vcmp.eq.f32.partialorder %v617_v14, 0.0 }
 0x1cb   : > { %v632_v17 = vmul.f32 %v1292_v15, %v620_v12  ;;  %v621_v18 = vsel %vm619_vm1, 1e-10, %v617_v14  ;;  %vm638_vm2 = vweird.f32 %v1292_v15 }
 0x1cc   : > { %1293 = vrsqrt.f32 %v621_v18  ;;  %vm639_vm5 = vmor %vm637_vm4, %vm638_vm2  ;;  %vm647_vm9 = vweird.f32 %v621_v18 }
 0x1cd   : > { %v633_v19 = vmul.f32 %v1292_v15, %v632_v17  ;;  %v873_v17 = vld [vmem:[#allocation6 + $0x10] sm:$0xff] }
 0x1ce   : > { %898 = vmatpush.msrb.mxu2 %v873_v17 }
 0x1cf   : > { %v634_v21 = vmul.f32 0.5, %v633_v19  ;;  %v871_v19 = vld [vmem:[#allocation6] sm:$0xff] }
 0x1d1   : > { %v635_v22 = vsub.f32 1.5, %v634_v21 }
 0x1d2   : > { %v1294_v23 = vpop.eup %1293 }
 0x1d3   : > { %v636_v24 = vmul.f32 %v1292_v15, %v635_v22  ;;  %v642_v26 = vmul.f32 %v1294_v23, %v621_v18  ;;  %vm648_vm8 = vweird.f32 %v1294_v23  ;;  %v872_v18 = vld [vmem:[#allocation6 + $0x8] sm:$0xff] }
 0x1d4   : > { %vm649_vm10 = vmor %vm647_vm9, %vm648_vm8  ;;  %899 = vmatpush.msrb.mxu2 %v872_v18 }
 0x1d5   : > { %v640_v27 = vsel %vm639_vm5, %v1292_v15, %v636_v24  ;;  %v643_v28 = vmul.f32 %v1294_v23, %v642_v26 }
 0x1d6   : > { %v651_v29 = vmul.f32 %v640_v27, %v609_v56  ;;  %v1274_v56 = vld [vmem:[%s1666_s4] ss:$0 sm:$0xff]  ;;  %900 = vmatpush.msrb.mxu2 %v871_v19 }
 0x1d7   : > { %v644_v31 = vmul.f32 0.5, %v643_v28 }
 0x1d8   : > { %v1564_v33 = vmul.f32 %v662_v30, %v651_v29 }
 0x1d9   : > { %v645_v34 = vsub.f32 1.5, %v644_v31  ;;  %v1215_v31 = vadd.f32 -1.0, %v1547_v61 }
 0x1da   : > { %665 = vst.msk [vmem:[%s496_s16] sm:$0xff] %vm611_vm13, %v1564_v33  ;;  %1203 = vmatmul.msk.f32.vlgmr.msra.gmra.mxu1 %vm611_vm13, %v1564_v33  ;;  %v955_v35 = vsel %vm611_vm13, %v1564_v33, 0.0  ;;  %v947_v36 = vmul.f32 %v1564_v33, %v1562_v32 }
 0x1db   : > { %v646_v37 = vmul.f32 %v1294_v23, %v645_v34  ;;  %956 = vadd.xlane.f32.xlu2 %v955_v35  ;;  %v1216_v35 = vadd.f32 -1.0, %v1552_v1 }
 0x1dc   : > { %v949_v38 = vsel %vm611_vm13, %v947_v36, 0.0  ;;  %v877_v36 = vmul.f32 1e+10, %v1215_v31 }
 0x1dd   : > { %v650_v39 = vsel %vm649_vm10, %v1294_v23, %v646_v37  ;;  %950 = vadd.xlane.f32.xlu0 %v949_v38  ;;  %v862_v23 = vpop.permute.xlu2 %861  ;;  %v878_v37 = vmul.f32 1e+10, %v1216_v35 }
 0x1de   : > { %v652_v40 = vmul.f32 %v650_v39, %v1545_v60 }
 0x1e0   : > { %v1581_v42 = vmul.f32 %v662_v30, %v652_v40 }
 0x1e2   : > { %666 = vst.msk [vmem:[%s496_s16 + $0x8] sm:$0xff] %vm611_vm13, %v1581_v42  ;;  %1204 = vmatmul.msk.f32.vlgmr.msra.gmra.mxu3 %vm611_vm13, %v1581_v42  ;;  %v948_v43 = vmul.f32 %v1581_v42, %v1579_v41  ;;  %v958_v45 = vsel %vm611_vm13, %v1581_v42, 0.0 }
 0x1e4   : > { %v952_v44 = vsel %vm611_vm13, %v948_v43, 0.0 }
 0x1e5   : > { %953 = vadd.xlane.f32.xlu1 %v952_v44  ;;  %959 = vadd.xlane.f32.xlu0 %v958_v45  ;;  %v867_v29 = vpop.permute.xlu2 %866 }
 0x257   : > { %v695_v50 = vpop.f32.mrf.mxu1 }
 0x258   : > { %1205 = vmatmul.msk.f32.vlgmr.msra.gmra.mxu2 %vm513_vm0, %v695_v50 }
 0x265   : > { %v698_v51 = vpop.f32.mrf.mxu3 }
 0x266   : > { %1206 = vmatmul.msk.f32.gmra.mxu2 %vm513_vm0, %v698_v51 }
 0x2db   : > { %v727_v55 = vpop.f32.mrf.mxu2 }
 0x2dc   : > { %v728_v58 = vadd.f32 %v1274_v56, %v727_v55 }
 0x2de   : > { %v733_v62 = vmax.f32 %v728_v58, 0.0 }
 0x2e9   : > { %v730_v57 = vpop.f32.mrf.mxu2 }
 0x2ea   : > { %v731_v59 = vadd.f32 %v1274_v56, %v730_v57 }
 0x2ec   : > { %v734_v60 = vmax.f32 %v731_v59, 0.0 }
 0x2ee   : > { %754 = vmatpush.msrb.mxu3 %v734_v60 }
 0x2f0   : > { %755 = vmatpush.msrb.mxu3 %v733_v62 }
 0x2f1   : > { %1207 = vmatmul.msk.f32.vlgmr.msrb.gmra.mxu3 %vm611_vm13, %v1564_v33 }
 0x2f9   : > { %1208 = vmatmul.msk.f32.gmra.mxu3 %vm611_vm13, %v1581_v42 }
 0x374   : > { %v757_v0 = vpop.f32.mrf.mxu3 }
 0x375   : > { %1209 = vmatmul.msk.f32.vlgmr.msrb.gmra.mxu1 %vm513_vm0, %v757_v0 }
 0x37c   : > { %v760_v2 = vpop.f32.mrf.mxu3 }
 0x37d   : > { %1210 = vmatmul.msk.f32.gmra.mxu1 %vm513_vm0, %v760_v2 }
 0x3f2   : > { %v789_v6 = vpop.f32.mrf.mxu1 }
 0x3f3   : > { %v790_v9 = vadd.f32 %v1275_v7, %v789_v6 }
 0x3f5   : > { %v795_v12 = vmax.f32 %v790_v9, 0.0 }
 0x3fa   : > { %v792_v8 = vpop.f32.mrf.mxu1 }
 0x3fb   : > { %v793_v10 = vadd.f32 %v1275_v7, %v792_v8 }
 0x3fd   : > { %v796_v11 = vmax.f32 %v793_v10, 0.0 }
 0x3ff   : > { %816 = vmatpush.msra.mxu3 %v796_v11 }
 0x401   : > { %817 = vmatpush.msra.mxu3 %v795_v12 }
 0x402   : > { %1211 = vmatmul.msk.f32.vlgmr.msra.gmra.mxu3 %vm611_vm13, %v1564_v33 }
 0x40a   : > { %1212 = vmatmul.msk.f32.gmra.mxu3 %vm611_vm13, %v1581_v42 }
 0x485   : > { %v819_v14 = vpop.f32.mrf.mxu3 }
 0x486   : > { %1213 = vmatmul.msk.f32.vlgmr.msrb.gmra.mxu0 %vm513_vm0, %v819_v14  ;;  %v957_v14 = vpop.xlane.xlu2 %956 }
 0x48d   : > { %v822_v15 = vpop.f32.mrf.mxu3 }
 0x48e   : > { %1214 = vmatmul.msk.f32.gmra.mxu0 %vm513_vm0, %v822_v15 }
 0x503   : > { %v851_v21 = vpop.f32.mrf.mxu0 }
 0x504   : > { %v852_v22 = vadd.f32 %v1276_v20, %v851_v21  ;;  %v954_v21 = vpop.xlane.xlu1 %953 }
 0x506   : > { %v857_v24 = vmax.f32 %v852_v22, 0.0 }
 0x508   : > { %v1627_v25 = vmul.f32 %v862_v23, %v857_v24 }
 0x50a   : > { %1217 = vmatmul.msk.f32.vlgmr.msrb.gmra.mxu2 %vm513_vm0, %v1627_v25 }
 0x50b   : > { %v854_v26 = vpop.f32.mrf.mxu0 }
 0x50c   : > { %v855_v27 = vadd.f32 %v1276_v20, %v854_v26 }
 0x50e   : > { %v858_v28 = vmax.f32 %v855_v27, 0.0 }
 0x510   : > { %v1631_v30 = vmul.f32 %v867_v29, %v858_v28 }
 0x512   : > { %1218 = vmatmul.msk.f32.gmra.mxu2 %vm513_vm0, %v1631_v30 }
 0x58d   : > { %v902_v34 = vpop.f32.mrf.mxu2 }
 0x58e   : > { %v903_v38 = vadd.f32 %v902_v34, %v877_v36 }
 0x590   : > { %v909_v43 = vsel %vm908_vm11, %v903_v38, -inf }
 0x595   : > { %v905_v39 = vpop.f32.mrf.mxu2 }
 0x596   : > { %v906_v40 = vadd.f32 %v905_v39, %v878_v37 }
 0x598   : > { %v910_v44 = vsel %vm908_vm11, %v906_v40, -inf }
 0x599   : > { %v911_v45 = vmax.f32 %v909_v43, %v910_v44 }
 0x59b   : > { %v912_v46 = vrot.slane %v911_v45, 4 }
 0x59d   : > { %v913_v47 = vmax.f32 %v911_v45, %v912_v46 }
 0x59f   : > { %v914_v48 = vrot.slane %v913_v47, 2 }
 0x5a1   : > { %v915_v49 = vmax.f32 %v913_v47, %v914_v48 }
 0x5a3   : > { %v916_v50 = vrot.slane %v915_v49, 1 }
 0x5a5   : > { %v917_v51 = vmax.f32 %v915_v49, %v916_v50 }
 0x5a7   : > { %v918_v52 = vsub.f32 %v903_v38, %v917_v51  ;;  %v919_v53 = vsub.f32 %v906_v40, %v917_v51 }
 0x5a9   : > { %v922_v54 = vmul.f32 1.442695, %v919_v53  ;;  %v920_v55 = vmul.f32 1.442695, %v918_v52 }
 0x5ab   : > { %1295 = vpow2.f32 %v922_v54 }
 0x5ac   : > { %1297 = vpow2.f32 %v920_v55 }
 0x5b1   : > { %v1296_v56 = vpop.eup %1295 }
 0x5b2   : > { %938 = vmatpush.msra.mxu1 %v1296_v56  ;;  %v1298_v57 = vpop.eup %1297  ;;  %v962_v23 = vmul.f32 %v1296_v56, %v954_v21 }
 0x5b4   : > { %939 = vmatpush.msra.mxu1 %v1298_v57 }
 0x5b5   : > { %1219 = vmatmul.msk.f32.vlgmr.msra.gmra.mxu1 %vm611_vm13, %v1564_v33  ;;  %v951_v33 = vpop.xlane.xlu0 %950 }
 0x5b6   : > { %v961_v9 = vmul.f32 %v1298_v57, %v951_v33 }
 0x5bd   : > { %1220 = vmatmul.msk.f32.gmra.mxu1 %vm611_vm13, %v1581_v42  ;;  %v960_v28 = vpop.xlane.xlu0 %959 }
 0x632   : > { %v941_v58 = vpop.f32.mrf.mxu1 }
 0x633   : > { %v942_v59 = vadd.f32 1e-10, %v941_v58 }
 0x635   : > { %1299 = vrcp.f32 %v942_v59  ;;  %v974_v3 = vand.u32 2147483648, %v942_v59  ;;  %v972_v5 = vand.u32 2147483647, %v942_v59  ;;  %vm968_vm14 = vweird.f32 %v942_v59 }
 0x637   : > { %v975_v8 = vor.u32 1.1754944e-38, %v974_v3  ;;  %vm973_vm1 = vcmp.eq.f32.partialorder %v972_v5, 8.507059e+37 }
 0x63a   : > { %v944_v60 = vpop.f32.mrf.mxu1 }
 0x63b   : > { %v1300_v62 = vpop.eup %1299  ;;  %v945_v63 = vadd.f32 1e-10, %v944_v60 }
 0x63c   : > { %v964_v0 = vmul.f32 %v1300_v62, %v942_v59  ;;  %vm969_vm12 = vweird.f32 %v1300_v62 }
 0x63d   : > { %1301 = vrcp.f32 %v945_v63  ;;  %vm970_vm15 = vmor %vm968_vm14, %vm969_vm12  ;;  %v989_v15 = vand.u32 2147483648, %v945_v63  ;;  %v987_v18 = vand.u32 2147483647, %v945_v63  ;;  %vm983_vm3 = vweird.f32 %v945_v63 }
 0x63e   : > { %v965_v2 = vsub.f32 1.0, %v964_v0 }
 0x63f   : > { %v990_v22 = vor.u32 1.1754944e-38, %v989_v15  ;;  %vm988_vm5 = vcmp.eq.f32.partialorder %v987_v18, 8.507059e+37 }
 0x640   : > { %v966_v4 = vmul.f32 %v1300_v62, %v965_v2 }
 0x642   : > { %v967_v6 = vadd.f32 %v1300_v62, %v966_v4 }
 0x643   : > { %v1302_v7 = vpop.eup %1301 }
 0x644   : > { %v979_v42 = vmul.f32 %v1302_v7, %v945_v63  ;;  %v971_v10 = vsel %vm970_vm15, %v1300_v62, %v967_v6  ;;  %vm984_vm2 = vweird.f32 %v1302_v7 }
 0x645   : > { %v976_v11 = vsel %vm973_vm1, %v975_v8, %v971_v10  ;;  %vm985_vm4 = vmor %vm983_vm3, %vm984_vm2 }
 0x646   : > { %v980_v12 = vsub.f32 1.0, %v979_v42  ;;  %v977_v13 = vmul.f32 %v976_v11, %v961_v9 }
 0x648   : > { %v981_v16 = vmul.f32 %v1302_v7, %v980_v12  ;;  %v993_v17 = vmul.f32 %v977_v13, %v957_v14 }
 0x64a   : > { %v995_v19 = vmul.f32 %v993_v17, %v1547_v61  ;;  %v982_v20 = vadd.f32 %v1302_v7, %v981_v16 }
 0x64c   : > { %999 = vperm.xlu1 %1272, %v995_v19   ;;  %v986_v24 = vsel %vm985_vm4, %v1302_v7, %v982_v20 }
 0x64d   : > { %v991_v26 = vsel %vm988_vm5, %v990_v22, %v986_v24 }
 0x64e   : > { %v992_v27 = vmul.f32 %v991_v26, %v962_v23 }
 0x650   : > { %v994_v29 = vmul.f32 %v992_v27, %v960_v28 }
 0x652   : > { %v996_v31 = vmul.f32 %v994_v29, %v1552_v1 }
 0x654   : > { %1004 = vperm.xlu0 %1273, %v996_v31  }
 0x6be   : > { %v1000_v61 = vpop.permute.xlu1 %999 }
 0x6bf   : > { %v1007_v34 = vmul.f32 %v1000_v61, %v1627_v25  ;;  %v1011_v35 = vmul.f32 %v1000_v61, %v1562_v32 }
 0x6c1   : > { %1009 = vst.msk [vmem:[%s504_s24] sm:$0xff] %vm513_vm0, %v1007_v34  ;;  %v1013_v1 = vsel %vm611_vm13, %v1011_v35, 0.0 }
 0x6c6   : > { %v1005_v36 = vpop.permute.xlu0 %1004 }
 0x6c7   : > { %v1008_v37 = vmul.f32 %v1005_v36, %v1631_v30  ;;  %v1012_v38 = vmul.f32 %v1005_v36, %v1579_v41 }
 0x6c9   : > { %1010 = vst.msk [vmem:[%s504_s24 + $0x8] sm:$0xff] %vm513_vm0, %v1008_v37  ;;  %v1014_v39 = vsel %vm611_vm13, %v1012_v38, 0.0 }
 0x6ca   : > { %v1015_v40 = vadd.f32 %v1014_v39, %v1013_v1 }
 0x6cc   : > { %v1016_v43 = vrot.slane %v1015_v40, 4 }
 0x6ce   : > { %v1017_v44 = vadd.f32 %v1016_v43, %v1015_v40 }
 0x6d0   : > { %v1018_v45 = vrot.slane %v1017_v44, 2 }
 0x6d2   : > { %v1019_v25 = vadd.f32 %v1018_v45, %v1017_v44 }
 0x6d4   : > { %v1020_v46 = vrot.slane %v1019_v25, 1 }
 0x6d6   : > { %v1021_v32 = vadd.f32 %v1020_v46, %v1019_v25 }
 0x6d8   : > { %1023 = vst.msk [vmem:[%s499_s27] sm:$0x1] %vm1022_vm6, %v1021_v32 }
 0x6d9 PF: > { %s25_s21 = sadd.s32 1, %s1407_s21  }
 0x6da   : > { %p22_p7 = scmp.ge.s32.totalorder %s25_s21, 4  }
 0x6dc   :  { %24 = sbr.rel (!%p22_p7) target bundleno = 2 (0x2), region = 130 }
 0x6e1   :  { %1073 = vsyncpa [#allocation3], 1 }
 0x6e2   :  { %1075 = vsyncpa [#allocation3 + $0x1], 1 }
 0x6e3   :  { %1076 = vsyncpa [#allocation5], 1 }

// kernel: classifier_forward.6
= control target key start
LH: loop header
LB: loop body
LE: loop exit
PB: predicated region body
PF: predicated region fallthrough
CT: control target
= control target key end

     0   :  { %s817_s27 = smov 0   ;;  %s941_s0 = inlined_call_operand.vmem [shape: f32[2,12,32], index: 0, kind: input, shape index: {}]   ;;  %s942_s1 = inlined_call_operand.vmem [shape: f32[2,12,12], index: 1, kind: input, shape index: {}]   ;;  %s943_s2 = inlined_call_operand.vmem [shape: f32[2,12,1], index: 2, kind: input, shape index: {}]   ;;  %s944_s3 = inlined_call_operand.vmem [shape: f32[12,12], index: 3, kind: input, shape index: {}]   ;;  %s945_s4 = inlined_call_operand.vmem [shape: f32[32,32], index: 4, kind: input, shape index: {}]   ;;  %s946_s5 = inlined_call_operand.vmem [shape: f32[1,32], index: 5, kind: input, shape index: {}]   ;;  %s947_s6 = inlined_call_operand.vmem [shape: f32[32,1], index: 6, kind: input, shape index: {}]   ;;  %s948_s7 = inlined_call_operand.vmem [shape: f32[2,1,12], index: 7, kind: output, shape index: {0}]   ;;  %s949_s8 = inlined_call_operand.vmem [shape: f32[2,12,32], index: 8, kind: output, shape index: {1}]  }
   0x1 LB: > { %s712_s28 = sadd.s32 4294967295, %s769_s27   ;;  %p716_p0 = scmp.ge.s32.totalorder %s769_s27, 1  ;;  %s769_s27 = sphi %s817_s27, %s19_s27  }
   0x2   : > { %p285_p1 = scmp.lt.s32.totalorder %s769_s27, 3 }
   0x4   : > { %p286_p2 = pnand %p716_p0, %p285_p1 }
   0x5   : > { %p332_p3 = scmp.lt.s32.totalorder (!%p286_p2), %s712_s28, 1 }
   0x6   : > { %289 = sbr.rel (%p286_p2) target bundleno = 745 (0x2e9), region = 48 }
   0xb   : > { %v366_v0 = vld [vmem:[%s945_s4 + $0x18] sm:$0xff]  ;;  %v365_v1 = vld [vmem:[%s945_s4 + $0x10] sm:$0xff]  ;;  %s951_s28 = smov (!%p332_p3, %s712_s28), 1  ;;  %v364_v2 = vld [vmem:[%s945_s4 + $0x8] sm:$0xff]  ;;  %vm375_vm0 = vcmask 1043456   ;;  %vm368_vm1 = vcmask 97280  }
   0xc   : > { %424 = vmatpush.msra.mxu1 %v366_v0  ;;  %s837_s13 = sshll.u32 %s951_s28, 4  ;;  %v363_v7 = vld [vmem:[%s945_s4] sm:$0xff]  ;;  %v771_v9 = vmov 0   ;;  %vm405_vm2 = vcmask 261120   ;;  %v452_v13 = vld [vmem:[%s947_s6 + $0x18] sm:$0xff]  ;;  %v451_v14 = vld [vmem:[%s947_s6 + $0x10] sm:$0xff]  ;;  %s349_s24 = scalar_lea.vmem %s948_s7, %s951_s28 }
   0xd   : > { %s336_s16 = scalar_lea.vmem %s941_s0, %s837_s13  ;;  %s341_s19 = scalar_lea.vmem %s942_s1, %s837_s13  ;;  %752 = vset.pattern.permute.xlu0 %v771_v9  ;;  %753 = vset.pattern.permute.xlu1 %v771_v9  ;;  %v450_v15 = vld [vmem:[%s947_s6 + $0x8] sm:$0xff]  ;;  %v449_v16 = vld [vmem:[%s947_s6] sm:$0xff]  ;;  %vm534_vm3 = vcmask 93184   ;;  %vm486_vm4 = vcmask 7168   ;;  %vm488_vm5 = vcmask 3072   ;;  %vm593_vm14 = vcmask 257024  }
   0xe   : > { %425 = vmatpush.msra.mxu1 %v365_v1  ;;  %v360_v3 = vld [vmem:[%s336_s16 + $0x8] sm:$0xf]  ;;  %v359_v4 = vld [vmem:[%s336_s16] sm:$0xff]  ;;  %s346_s22 = scalar_lea.vmem %s943_s2, %s837_s13  ;;  %475 = vmatpush.msra.mxu2 %v452_v13  ;;  %vm606_vm15 = vcmask 90112  }
   0xf   : > { %725 = vmatpush.msk.msra.mxu0 %vm375_vm0, %v360_v3  ;;  %v848_v5 = vld [vmem:[%s341_s19] sm:$0xff]  ;;  %v852_v6 = vld [vmem:[%s341_s19 + $0x8] sm:$0xf] }
  0x10   : > { %426 = vmatpush.msra.mxu1 %v364_v2  ;;  %v863_v8 = vld [vmem:[%s346_s22] sm:$0xff]  ;;  %v866_v10 = vld [vmem:[%s346_s22 + $0x8] sm:$0xf]  ;;  %476 = vmatpush.msra.mxu2 %v451_v14  ;;  %v538_v47 = vsel %vm368_vm1, %v848_v5, 0.0  ;;  %v541_v51 = vsel %vm534_vm3, %v852_v6, 0.0  ;;  %s354_s22 = scalar_lea.vmem %s949_s8, %s837_s13 }
  0x11   : > { %394 = vmatpush.msra.mxu0 %v359_v4  ;;  %439 = vperm.xlu0 %752, %v863_v8   ;;  %v886_v17 = vld [vmem:[%s944_s3] sm:$0xff]  ;;  %v893_v19 = vld [vmem:[%s944_s3 + $0x8] sm:$0xf]  ;;  %v730_v34 = vadd.f32 -1.0, %v863_v8  ;;  %v731_v36 = vadd.f32 -1.0, %v866_v10 }
  0x12   : > { %726 = vmatmul.msk.f32.vlgmr.msra.gmra.mxu0 %vm368_vm1, %v848_v5  ;;  %427 = vmatpush.msra.mxu1 %v363_v7  ;;  %v529_v18 = vmul.f32 %v848_v5, %v886_v17  ;;  %v530_v21 = vmul.f32 %v852_v6, %v893_v19  ;;  %v754_v23 = vld [vmem:[%s946_s5] ss:$0 sm:$0xff] }
  0x13   : > { %477 = vmatpush.msra.mxu2 %v450_v15  ;;  %v455_v37 = vmul.f32 1e+10, %v730_v34  ;;  %v456_v38 = vmul.f32 1e+10, %v731_v36  ;;  %539 = vadd.xlane.f32.xlu2 %v538_v47 }
  0x14   : > { %v531_v20 = vsel %vm368_vm1, %v529_v18, 0.0  ;;  %v535_v22 = vsel %vm534_vm3, %v530_v21, 0.0 }
  0x15   : > { %478 = vmatpush.msra.mxu2 %v449_v16  ;;  %532 = vadd.xlane.f32.xlu1 %v531_v20 }
  0x19   : > { %444 = vperm.xlu0 %752, %v866_v10  }
  0x1a   : > { %727 = vmatmul.msk.f32.gmra.mxu0 %vm368_vm1, %v852_v6 }
  0x1b   : > { %542 = vadd.xlane.f32.xlu2 %v541_v51 }
  0x1d   : > { %536 = vadd.xlane.f32.xlu1 %v535_v22 }
  0x83   : > { %v440_v26 = vpop.permute.xlu0 %439 }
  0x88   : > { %v533_v2 = vpop.xlane.xlu1 %532 }
  0x8b   : > { %v445_v32 = vpop.permute.xlu0 %444 }
  0x8f   : > { %v396_v11 = vpop.f32.mrf.mxu0 }
  0x90   : > { %728 = vmatmul.msk.f32.vlgmr.msra.gmra.mxu1 %vm405_vm2, %v396_v11  ;;  %v540_v11 = vpop.xlane.xlu2 %539 }
  0x97   : > { %v399_v12 = vpop.f32.mrf.mxu0 }
  0x98   : > { %729 = vmatmul.msk.f32.gmra.mxu1 %vm405_vm2, %v399_v12 }
 0x10d   : > { %v429_v24 = vpop.f32.mrf.mxu1 }
 0x10e   : > { %v430_v25 = vadd.f32 %v754_v23, %v429_v24  ;;  %v537_v24 = vpop.xlane.xlu1 %536 }
 0x110   : > { %v435_v27 = vmax.f32 %v430_v25, 0.0 }
 0x112   : > { %v902_v28 = vmul.f32 %v440_v26, %v435_v27 }
 0x114   : > { %732 = vmatmul.msk.f32.vlgmr.msra.gmra.mxu2 %vm405_vm2, %v902_v28 }
 0x115   : > { %v432_v29 = vpop.f32.mrf.mxu1 }
 0x116   : > { %v433_v30 = vadd.f32 %v754_v23, %v432_v29 }
 0x118   : > { %v436_v31 = vmax.f32 %v433_v30, 0.0 }
 0x11a   : > { %v906_v33 = vmul.f32 %v445_v32, %v436_v31  ;;  %v543_v31 = vpop.xlane.xlu2 %542 }
 0x11c   : > { %733 = vmatmul.msk.f32.gmra.mxu2 %vm405_vm2, %v906_v33 }
 0x197   : > { %v480_v35 = vpop.f32.mrf.mxu2 }
 0x198   : > { %v481_v39 = vadd.f32 %v480_v35, %v455_v37 }
 0x19a   : > { %v487_v42 = vsel %vm486_vm4, %v481_v39, -inf }
 0x19f   : > { %v483_v40 = vpop.f32.mrf.mxu2 }
 0x1a0   : > { %v484_v41 = vadd.f32 %v483_v40, %v456_v38 }
 0x1a2   : > { %v489_v43 = vsel %vm488_vm5, %v484_v41, -inf }
 0x1a3   : > { %v490_v44 = vmax.f32 %v487_v42, %v489_v43 }
 0x1a5   : > { %v491_v45 = vrot.slane %v490_v44, 4 }
 0x1a7   : > { %v492_v46 = vmax.f32 %v490_v44, %v491_v45 }
 0x1a9   : > { %v493_v48 = vrot.slane %v492_v46, 2 }
 0x1ab   : > { %v494_v49 = vmax.f32 %v492_v46, %v493_v48 }
 0x1ad   : > { %v495_v50 = vrot.slane %v494_v49, 1 }
 0x1af   : > { %v496_v52 = vmax.f32 %v494_v49, %v495_v50 }
 0x1b1   : > { %v497_v53 = vsub.f32 %v481_v39, %v496_v52  ;;  %v498_v54 = vsub.f32 %v484_v41, %v496_v52 }
 0x1b3   : > { %v499_v55 = vmul.f32 1.442695, %v497_v53  ;;  %v501_v56 = vmul.f32 1.442695, %v498_v54 }
 0x1b5   : > { %755 = vpow2.f32 %v501_v56 }
 0x1b6   : > { %757 = vpow2.f32 %v499_v55 }
 0x1bb   : > { %v756_v57 = vpop.eup %755 }
 0x1bc   : > { %734 = vmatpush.msk.msra.mxu3 %vm375_vm0, %v756_v57  ;;  %v758_v58 = vpop.eup %757  ;;  %v545_v29 = vmul.f32 %v756_v57, %v537_v24 }
 0x1bd   : > { %v544_v12 = vmul.f32 %v758_v58, %v533_v2 }
 0x1be   : > { %521 = vmatpush.msra.mxu3 %v758_v58 }
 0x1bf   : > { %735 = vmatmul.msk.f32.vlgmr.msra.gmra.mxu3 %vm368_vm1, %v848_v5 }
 0x1c7   : > { %736 = vmatmul.msk.f32.gmra.mxu3 %vm368_vm1, %v852_v6 }
 0x242   : > { %v523_v59 = vpop.f32.mrf.mxu3 }
 0x243   : > { %v524_v60 = vadd.f32 1e-10, %v523_v59 }
 0x245   : > { %759 = vrcp.f32 %v524_v60  ;;  %v557_v3 = vand.u32 2147483648, %v524_v60  ;;  %v555_v7 = vand.u32 2147483647, %v524_v60  ;;  %vm551_vm7 = vweird.f32 %v524_v60 }
 0x247   : > { %v558_v6 = vor.u32 1.1754944e-38, %v557_v3  ;;  %vm556_vm9 = vcmp.eq.f32.partialorder %v555_v7, 8.507059e+37 }
 0x24a   : > { %v526_v61 = vpop.f32.mrf.mxu3 }
 0x24b   : > { %v760_v62 = vpop.eup %759  ;;  %v527_v63 = vadd.f32 1e-10, %v526_v61 }
 0x24c   : > { %v547_v0 = vmul.f32 %v760_v62, %v524_v60  ;;  %vm552_vm6 = vweird.f32 %v760_v62 }
 0x24d   : > { %761 = vrcp.f32 %v527_v63  ;;  %vm553_vm8 = vmor %vm551_vm7, %vm552_vm6  ;;  %v572_v20 = vand.u32 2147483648, %v527_v63  ;;  %v570_v23 = vand.u32 2147483647, %v527_v63  ;;  %vm566_vm11 = vweird.f32 %v527_v63 }
 0x24e   : > { %v548_v1 = vsub.f32 1.0, %v547_v0 }
 0x24f   : > { %v573_v27 = vor.u32 1.1754944e-38, %v572_v20  ;;  %vm571_vm13 = vcmp.eq.f32.partialorder %v570_v23, 8.507059e+37 }
 0x250   : > { %v549_v4 = vmul.f32 %v760_v62, %v548_v1 }
 0x252   : > { %v550_v9 = vadd.f32 %v760_v62, %v549_v4 }
 0x253   : > { %v762_v5 = vpop.eup %761 }
 0x254   : > { %v562_v13 = vmul.f32 %v762_v5, %v527_v63  ;;  %v554_v14 = vsel %vm553_vm8, %v760_v62, %v550_v9  ;;  %vm567_vm10 = vweird.f32 %v762_v5 }
 0x255   : > { %v559_v15 = vsel %vm556_vm9, %v558_v6, %v554_v14  ;;  %vm568_vm12 = vmor %vm566_vm11, %vm567_vm10 }
 0x256   : > { %v563_v16 = vsub.f32 1.0, %v562_v13  ;;  %v560_v18 = vmul.f32 %v559_v15, %v544_v12 }
 0x258   : > { %v576_v21 = vmul.f32 %v560_v18, %v540_v11  ;;  %v564_v22 = vmul.f32 %v762_v5, %v563_v16 }
 0x25a   : > { %v578_v25 = vmul.f32 %v576_v21, %v863_v8  ;;  %v565_v26 = vadd.f32 %v762_v5, %v564_v22 }
 0x25c   : > { %582 = vperm.xlu0 %752, %v578_v25   ;;  %v569_v30 = vsel %vm568_vm12, %v762_v5, %v565_v26 }
 0x25d   : > { %v574_v32 = vsel %vm571_vm13, %v573_v27, %v569_v30 }
 0x25e   : > { %v575_v34 = vmul.f32 %v574_v32, %v545_v29 }
 0x260   : > { %v577_v35 = vmul.f32 %v575_v34, %v543_v31 }
 0x262   : > { %v579_v36 = vmul.f32 %v577_v35, %v866_v10 }
 0x264   : > { %587 = vperm.xlu1 %753, %v579_v36  }
 0x2ce   : > { %v583_v8 = vpop.permute.xlu0 %582 }
 0x2cf   : > { %v590_v37 = vmul.f32 %v583_v8, %v902_v28  ;;  %v595_v38 = vmul.f32 %v583_v8, %v886_v17 }
 0x2d1   : > { %592 = vst.msk [vmem:[%s354_s22] sm:$0xff] %vm405_vm2, %v590_v37  ;;  %v597_v10 = vsel %vm368_vm1, %v595_v38, 0.0 }
 0x2d6   : > { %v588_v39 = vpop.permute.xlu1 %587 }
 0x2d7   : > { %v591_v40 = vmul.f32 %v588_v39, %v906_v33  ;;  %v596_v41 = vmul.f32 %v588_v39, %v893_v19 }
 0x2d9   : > { %594 = vst.msk [vmem:[%s354_s22 + $0x8] sm:$0xf] %vm593_vm14, %v591_v40  ;;  %v598_v42 = vsel %vm534_vm3, %v596_v41, 0.0 }
 0x2da   : > { %v599_v43 = vadd.f32 %v598_v42, %v597_v10 }
 0x2dc   : > { %v600_v44 = vrot.slane %v599_v43, 4 }
 0x2de   : > { %v601_v45 = vadd.f32 %v600_v44, %v599_v43 }
 0x2e0   : > { %v602_v28 = vrot.slane %v601_v45, 2 }
 0x2e2   : > { %v603_v46 = vadd.f32 %v602_v28, %v601_v45 }
 0x2e4   : > { %v604_v47 = vrot.slane %v603_v46, 1 }
 0x2e6   : > { %v605_v17 = vadd.f32 %v604_v47, %v603_v46 }
 0x2e8   : > { %607 = vst.msk [vmem:[%s349_s24] sm:$0x1] %vm606_vm15, %v605_v17 }
 0x2e9 PF: > { %s19_s27 = sadd.s32 1, %s769_s27  }
 0x2ea   : > { %p16_p4 = scmp.ge.s32.totalorder %s19_s27, 4  }
 0x2ec   :  { %18 = sbr.rel (!%p16_p4) target bundleno = 1 (0x1), region = 96 }

// kernel: classifier_forward.7
= control target key start
LH: loop header
LB: loop body
LE: loop exit
PB: predicated region body
PF: predicated region fallthrough
CT: control target
= control target key end

     0   :  { %11 = vsyncpa [#allocation3], 0  ;;  %s926_s0 = inlined_call_operand.vmem [shape: s32[2,9,1], index: 0, kind: input, shape index: {}]   ;;  %s927_s1 = inlined_call_operand.vmem [shape: f32[2,9,1], index: 1, kind: input, shape index: {}]   ;;  %s928_s2 = inlined_call_operand.vmem [shape: f32[2,12,32], index: 2, kind: input, shape index: {}]   ;;  %s929_s3 = inlined_call_operand.vmem [shape: f32[2,12,12], index: 3, kind: input, shape index: {}]   ;;  %s930_s4 = inlined_call_operand.vmem [shape: f32[2,9,32], index: 4, kind: output, shape index: {0}]   ;;  %s931_s5 = inlined_call_operand.hbm [shape: f32[2,9,9], index: 5, kind: output, shape index: {1}]  }
   0x1   :  { %13 = vsyncpa [#allocation3 + $0x1], 0  ;;  %s808_s18 = smov 0   ;;  %s810_s19 = smov 0  }
   0x2   :  { %s812_s20 = smov 0   ;;  %s814_s21 = smov 0  }
   0x3 LB: > { %s829_s22 = sadd.s32 4294967295, %s773_s21   ;;  %s626_s23 = sadd.s32 4294967294, %s773_s21   ;;  %s773_s21 = sphi %s814_s21, %s937_s21   ;;  %s769_s20 = sphi %s812_s20, %s936_s20   ;;  %s765_s19 = sphi %s810_s19, %s935_s19   ;;  %s761_s18 = sphi %s808_s18, %s934_s18  }
   0x4   : > { %s833_s24 = sadd.s32 1, %s773_s21   ;;  %s156_s25 = sadd.s32 1, %s769_s20 }
   0x5   : > { %s153_s26 = ssub.s32 %s773_s21, %s833_s24  ;;  %p166_p0 = scmp.ne.s32.totalorder %s769_s20, %s765_s19 }
   0x6   : > { %p154_p1 = scmp.eq.s32.totalorder %s153_s26, 0  ;;  %p167_p2 = scmp.eq.s32.totalorder %s829_s22, 1 }
   0x7   : > { %p172_p3 = scmp.ne.s32.totalorder %s765_s19, %s761_s18  ;;  %p173_p4 = scmp.eq.s32.totalorder %s626_s23, 1 }
   0x8   : > { %s844_s27 = scalar_select %p154_p1, %s769_s20, %s156_s25  }
   0x9   : > { %p846_p5 = por %p167_p2, %p166_p0  ;;  %p850_p6 = por %p173_p4, %p172_p3 }
   0xa   : > { %p629_p7 = scmp.ge.s32.totalorder %s773_s21, 1  ;;  %p223_p8 = scmp.lt.s32.totalorder %s773_s21, 3 }
   0xc   : > { %p224_p9 = pnand %p629_p7, %p223_p8 }
   0xd   : > { %p271_p10 = scmp.lt.s32.totalorder (!%p224_p9), %s829_s22, 1  ;;  %s268_s7 = sand.u32 (!%p224_p9), 1, %s765_s19  }
   0xe   : > { %227 = sbr.rel (%p224_p9) target bundleno = 594 (0x252), region = 36  ;;  %s630_s8 = sshll.u32 (!%p224_p9), %s268_s7, 4 }
   0xf   : > { %s270_s10 = scalar_lea.vmem (!%p224_p9), [#allocation2], %s630_s8  ;;  %s731_s25 = scalar_lea.hbm (!%p224_p9), %s931_s5, 32 }
  0x10   : > { %s500_s13 = sshll.u32 (!%p224_p9), %s270_s10, 4  ;;  %s501_s13 = int_to_ptr.vmem [resolvable:$true] %s500_s13 }
  0x13   : > { %v775_v0 = vmov 0   ;;  %s272_s30 = scalar_select %p271_p10, %s829_s22, 1  ;;  %vm333_vm0 = vcmask 1043456   ;;  %v304_v7 = vlaneseq  ;;  %vm326_vm1 = vcmask 97280  }
  0x14   : > { %708 = vset.pattern.permute.xlu1 %v775_v0  ;;  %707 = vset.pattern.permute.xlu0 %v775_v0  ;;  %vm361_vm4 = vcmask 90112   ;;  %vm419_vm9 = vcmask 261120   ;;  %vm421_vm10 = vcmask 253952   ;;  %vm475_vm11 = vcmask 72704  }
  0x15   : > { %s858_s6 = sshll.u32 %s272_s30, 4  ;;  %v305_v9 = vand.u32 127, %v304_v7  ;;  %vm477_vm12 = vcmask 65536  }
  0x16   : > { %s275_s9 = scalar_lea.vmem %s926_s0, %s858_s6  ;;  %s280_s12 = scalar_lea.vmem %s927_s1, %s858_s6 }
  0x17   : > { %v297_v1 = vld [vmem:[%s275_s9 + $0x8] sm:$0x1]  ;;  %v296_v2 = vld [vmem:[%s275_s9] sm:$0xff]  ;;  %s290_s15 = scalar_lea.vmem %s929_s3, %s858_s6  ;;  %s285_s23 = scalar_lea.vmem %s928_s2, %s858_s6 }
  0x18   : > { %310 = vperm.xlu1 %708, %v297_v1   ;;  %307 = vperm.xlu0 %707, %v296_v2   ;;  %v299_v3 = vld [vmem:[%s280_s12 + $0x8] sm:$0x1]  ;;  %v298_v4 = vld [vmem:[%s280_s12] sm:$0xff]  ;;  %s295_s30 = scalar_lea.vmem %s930_s4, %s858_s6  ;;  %s664_s9 = sshll.u32 %s829_s22, 4 }
  0x19   : > { %v303_v5 = vld [vmem:[%s290_s15 + $0x8] sm:$0xf]  ;;  %v302_v6 = vld [vmem:[%s290_s15] sm:$0xff]  ;;  %s499_s12 = scalar_lea.hbm %s931_s5, %s664_s9  ;;  %s485_s15 = scalar_lea.sflag [#allocation3], %s268_s7 }
  0x1a   : > { %641 = vmatpush.msk.msra.mxu0 %vm333_vm0, %v303_v5  ;;  %647 = vmatpush.msk.msra.mxu2 %vm333_vm0, %v303_v5  ;;  %v301_v19 = vld [vmem:[%s285_s23 + $0x8] sm:$0xf]  ;;  %v300_v21 = vld [vmem:[%s285_s23] sm:$0xff]  ;;  %s502_s14 = sshll.u32 %s499_s12, 4  ;;  %s503_s14 = int_to_ptr.hbm [resolvable:$true] %s502_s14 }
  0x1b   : > { %644 = vmatpush.msk.msra.mxu1 %vm333_vm0, %v301_v19  ;;  %s725_s16 = sshra.s32 %s503_s14, 4  ;;  %s726_s16 = int_to_ptr.hbm [resolvable:$true] %s725_s16 }
  0x1c   : > { %352 = vmatpush.msra.mxu0 %v302_v6  ;;  %438 = vmatpush.msra.mxu2 %v302_v6  ;;  %s727_s17 = scalar_lea.hbm %s726_s16, 16  ;;  %p732_p0 = scmp.lt.s32.totalorder %s726_s16, %s931_s5 }
  0x1d   : > { %411 = vmatpush.msra.mxu1 %v300_v21  ;;  %p728_p11 = scmp.ne.s32.totalorder %s726_s16, %s727_s17  ;;  %p733_p1 = scmp.lt.s32.totalorder %s731_s25, %s727_s17 }
  0x1f   : > { %p729_p12 = pnand %p728_p11, %p846_p5  ;;  %p734_p2 = por %p733_p1, %p732_p0 }
  0x20   : > { %321 = vperm.xlu1 %708, %v299_v3   ;;  %316 = vperm.xlu0 %707, %v298_v4  }
  0x21   : > { %p730_p13 = pneg %p729_p12 }
  0x23   : > { %p735_p3 = pnand %p734_p2, %p730_p13 }
  0x8a   : > { %v308_v8 = vpop.permute.xlu0 %307  ;;  %v311_v10 = vpop.permute.xlu1 %310 }
  0x8b   : > { %vm312_vm2 = vcmp.eq.s32.totalorder %v305_v9, %v308_v8  ;;  %vm313_vm3 = vcmp.eq.s32.totalorder %v305_v9, %v311_v10 }
  0x92   : > { %v317_v11 = vpop.permute.xlu0 %316  ;;  %v322_v13 = vpop.permute.xlu1 %321 }
  0x93   : > { %v324_v12 = vsel %vm312_vm2, %v317_v11, 0.0  ;;  %v325_v14 = vsel %vm313_vm3, %v322_v13, 0.0 }
  0x94   : > { %642 = vmatmul.msk.f32.vlgmr.msra.gmra.mxu0 %vm326_vm1, %v324_v12 }
  0x9c   : > { %643 = vmatmul.msk.f32.gmra.mxu0 %vm326_vm1, %v325_v14 }
 0x111   : > { %v354_v15 = vpop.f32.mrf.mxu0 }
 0x112   : > { %v360_v17 = vsel %vm326_vm1, %v354_v15, 0.0 }
 0x119   : > { %v357_v16 = vpop.f32.mrf.mxu0 }
 0x11a   : > { %v362_v18 = vsel %vm361_vm4, %v357_v16, 0.0 }
 0x11b   : > { %v363_v20 = vadd.f32 %v362_v18, %v360_v17 }
 0x11d   : > { %v364_v22 = vrot.slane %v363_v20, 4 }
 0x11f   : > { %v365_v23 = vadd.f32 %v364_v22, %v363_v20 }
 0x121   : > { %v366_v24 = vrot.slane %v365_v23, 2 }
 0x123   : > { %v367_v25 = vadd.f32 %v366_v24, %v365_v23 }
 0x125   : > { %v368_v26 = vrot.slane %v367_v25, 1 }
 0x127   : > { %v369_v27 = vadd.f32 %v368_v26, %v367_v25 }
 0x129   : > { %v370_v28 = vadd.f32 1e-10, %v369_v27 }
 0x12b   : > { %709 = vrcp.f32 %v370_v28  ;;  %v382_v32 = vand.u32 2147483648, %v370_v28  ;;  %v380_v34 = vand.u32 2147483647, %v370_v28  ;;  %vm376_vm6 = vweird.f32 %v370_v28 }
 0x12d   : > { %v383_v36 = vor.u32 1.1754944e-38, %v382_v32  ;;  %vm381_vm8 = vcmp.eq.f32.partialorder %v380_v34, 8.507059e+37 }
 0x131   : > { %v710_v29 = vpop.eup %709 }
 0x132   : > { %v372_v30 = vmul.f32 %v710_v29, %v370_v28  ;;  %vm377_vm5 = vweird.f32 %v710_v29 }
 0x133   : > { %vm378_vm7 = vmor %vm376_vm6, %vm377_vm5 }
 0x134   : > { %v373_v31 = vsub.f32 1.0, %v372_v30 }
 0x136   : > { %v374_v33 = vmul.f32 %v710_v29, %v373_v31 }
 0x138   : > { %v375_v35 = vadd.f32 %v710_v29, %v374_v33 }
 0x13a   : > { %v379_v37 = vsel %vm378_vm7, %v710_v29, %v375_v35 }
 0x13b   : > { %v384_v38 = vsel %vm381_vm8, %v383_v36, %v379_v37 }
 0x13c   : > { %v385_v39 = vmul.f32 %v384_v38, %v354_v15  ;;  %v386_v40 = vmul.f32 %v384_v38, %v357_v16 }
 0x13e   : > { %645 = vmatmul.msk.f32.vlgmr.msra.gmra.mxu1 %vm326_vm1, %v385_v39  ;;  %648 = vmatmul.msk.f32.vlgmr.msra.gmra.mxu2 %vm326_vm1, %v385_v39 }
 0x13f   : > { %650 = vmatpush.xpose.msk.msra.mxu3 %vm326_vm1, %v386_v40 }
 0x143   : > { %651 = vmatpush.xpose.msk.msra.mxu3 %vm326_vm1, %v385_v39 }
 0x146   : > { %646 = vmatmul.msk.f32.gmra.mxu1 %vm326_vm1, %v386_v40  ;;  %649 = vmatmul.msk.f32.gmra.mxu2 %vm326_vm1, %v386_v40 }
 0x1bb   : > { %v413_v41 = vpop.f32.mrf.mxu1 }
 0x1bc   : > { %420 = vst.msk [vmem:[%s295_s30] sm:$0xff] %vm419_vm9, %v413_v41 }
 0x1c1   : > { %v440_v42 = vpop.f32.mrf.mxu2 }
 0x1c2   : > { %652 = vmatmul.msk.f32.vlgmr.msra.gmra.mxu3 %vm326_vm1, %v440_v42 }
 0x1c3   : > { %v416_v43 = vpop.f32.mrf.mxu1 }
 0x1c4   : > { %422 = vst.msk [vmem:[%s295_s30 + $0x8] sm:$0x1] %vm421_vm10, %v416_v43 }
 0x1c9   : > { %v443_v44 = vpop.f32.mrf.mxu2 }
 0x1ca   : > { %653 = vmatmul.msk.f32.gmra.mxu3 %vm326_vm1, %v443_v44 }
 0x245   : > { %v469_v45 = vpop.f32.mrf.mxu3 }
 0x246   : > { %476 = vst.msk [vmem:[%s270_s10] sm:$0xff] %vm475_vm11, %v469_v45 }
 0x24d   : > { %v472_v46 = vpop.f32.mrf.mxu3 }
 0x24e   : > { %478 = vst.msk [vmem:[%s270_s10 + $0x8] sm:$0x1] %vm477_vm12, %v472_v46 }
 0x24f   : > { %738 = shalt.err (!%p735_p3)
}
 0x250   : > { %s776_s7 = smov 128   ;;  %s777_s8 = smov 8  }
 0x251   : > { %665 = dma.vmem_to_hbm [thread:$0]  (%p846_p5), %s501_s13, 256, %s503_s14, %s485_s15, %s776_s7, %s776_s7, %s777_s8  }
 0x252 PF: > { %p671_p4 = scmp.ge.s32.totalorder %s773_s21, 2  ;;  %s525_s9 = sand.u32 1, %s761_s18  }
 0x253   : > { %s526_s10 = scalar_lea.sflag [#allocation3], %s525_s9 }
 0x254   : > { %p668_p7 = pnand %p671_p4, %p850_p6 }
 0x256   : > { %p669_p8 = pneg %p668_p7 }
 0x258   : > { %756 = dma.done.wait (%p669_p8), %s526_s10, 256  }
 0x259   : > { %758 = vsyncadd (%p669_p8), %s526_s10, 4294967040  ;;  %p16_p9 = scmp.ge.s32.totalorder %s833_s24, 4   ;;  %s934_s18 = smov %s765_s19 }
 0x25a   : > { %s935_s19 = smov %s769_s20  ;;  %s936_s20 = smov %s844_s27 }
 0x25b   : > { %s937_s21 = smov %s833_s24  ;;  %18 = sbr.rel (!%p16_p9) target bundleno = 3 (0x3), region = 92 }
 0x260   :  { %532 = vsyncpa [#allocation3], 1 }
 0x261   :  { %534 = vsyncpa [#allocation3 + $0x1], 1 }

</bundles_post_ra>
